<compile_context>
chip_gen: v6e
topology: v6e:2x2x1
jax: 0.10.0
libtpu: 0.0.40
codegen_flags: <defaults>
</compile_context>

<pallas_src>
import math
from functools import partial

import jax
import jax.numpy as jnp
from jax import lax
from jax.experimental import pallas as pl
from jax.experimental.pallas import tpu as pltpu


# ---------------------------------------------------------------------------
# fused kernel
# ---------------------------------------------------------------------------
def _layernorm(v, g, b, eps=1e-5):           # PyTorch LayerNorm (biased var, eps=1e-5)
    mean = jnp.mean(v, axis=-1, keepdims=True)
    c = v - mean
    var = jnp.mean(c * c, axis=-1, keepdims=True)
    return c * lax.rsqrt(var + eps) * g + b


def _cross_attention_kernel(
    x_ref,          # (B*N,  dim)   encoder tokens, flattened over batch
    qx_ref,         # (B*Nq, dim)   query tokens, flattened over batch
    vec_ref,        # (8, dim)      rows: ln1_g, ln1_b, ln2_g, ln2_b, sa_out_b, ca_out_b, 0, 0
    w_qkv_ref,      # (3, heads, dim, dim_head)  to_qkv (softmax scale folded into [0])
    w_sa_out_ref,   # (heads, dim_head, dim)     Attention.to_out weight (head-blocked)
    w_q_ref,        # (heads, dim, dim_head)     to_q (softmax scale folded)
    w_kv_ref,       # (2, heads, dim, dim_head)  to_kv
    w_ca_out_ref,   # (heads, dim_head, dim)     CrossAttention.to_out weight (head-blocked)
    out_ref,        # (2, B*Nq, dim)   [0] = to_out(out), [1] = q_in
    *, B, N, Nq, heads):

    def attn_block(src_q, src_kv, nq, nkv, wq, wk, wv, wout, bias, approx_recip):
        """sum_h softmax(q_h k_h^T) v_h @ W_out[h] + bias   (merge-heads fused as a sum).

        Projections are per-head (heads indexed on a leading weight axis) so q/k/v stay
        lane-contiguous; attention itself is per batch (sublane-aligned 8-row slices).
        """
        acc = None
        for h in range(heads):                                   # static unroll (heads small)
            q_h = jnp.dot(src_q, wq(h), preferred_element_type=jnp.float32)   # (B*nq,  d)
            k_h = jnp.dot(src_kv, wk(h), preferred_element_type=jnp.float32)  # (B*nkv, d)
            v_h = jnp.dot(src_kv, wv(h), preferred_element_type=jnp.float32)  # (B*nkv, d)
            o_parts = []
            for b in range(B):                                   # static unroll (B small)
                qb = q_h[b * nq:(b + 1) * nq]
                kb = k_h[b * nkv:(b + 1) * nkv]
                vb = v_h[b * nkv:(b + 1) * nkv]
                # contract last dims of q and k directly: no explicit k.T relayout
                s = lax.dot_general(qb, kb, (((1,), (1,)), ((), ())),
                                    preferred_element_type=jnp.float32)       # (nq, nkv)
                s = s - jnp.max(s, axis=-1, keepdims=True)
                p = jnp.exp(s)
                d = jnp.sum(p, axis=-1, keepdims=True)
                if approx_recip:
                    p = p * pl.reciprocal(d, approx=True)        # EUP slot
                else:
                    p = p / d                                    # exact (feeds residual/LN)
                o_parts.append(jnp.dot(p, vb, preferred_element_type=jnp.float32))
            o_h = o_parts[0] if B == 1 else jnp.concatenate(o_parts, axis=0)  # (B*nq, d)
            contrib = jnp.dot(o_h, wout(h), preferred_element_type=jnp.float32)  # (B*nq, dim)
            acc = contrib if acc is None else acc + contrib
        return acc + bias

    x = x_ref[...]      # (B*N,  dim)
    qx = qx_ref[...]    # (B*Nq, dim)

    # ---- q_in = PreNorm(Attention)(q_x) + q_x ; q_in = LayerNorm(q_in) -------
    qxn = _layernorm(qx, vec_ref[0:1, :], vec_ref[1:2, :])
    sa = attn_block(qxn, qxn, Nq, Nq,
                    lambda h: w_qkv_ref[0, h], lambda h: w_qkv_ref[1, h],
                    lambda h: w_qkv_ref[2, h],
                    lambda h: w_sa_out_ref[h],
                    vec_ref[4:5, :], approx_recip=False)
    q_in = _layernorm(sa + qx, vec_ref[2:3, :], vec_ref[3:4, :])

    # ---- cross attention: q from q_in, k/v from encoder output x -------------
    out = attn_block(q_in, x, Nq, N,
                     lambda h: w_q_ref[h], lambda h: w_kv_ref[0, h],
                     lambda h: w_kv_ref[1, h],
                     lambda h: w_ca_out_ref[h],
                     vec_ref[5:6, :], approx_recip=True)

    out_ref[0] = out.astype(out_ref.dtype)
    out_ref[1] = q_in.astype(out_ref.dtype)


# ---------------------------------------------------------------------------
# one-time parameter prep: head-blocked weights, packed vectors, folded scale
# ---------------------------------------------------------------------------
def prepare_params(p, *, dim, heads, dim_head):
    scale = dim_head ** -0.5
    # to_qkv: (dim, 3*inner) -> (3, heads, dim, dim_head); fold softmax scale into q part
    w_qkv = p["qkv_w"].reshape(dim, 3, heads, dim_head).transpose(1, 2, 0, 3)
    w_qkv = w_qkv.at[0].multiply(scale)
    # to_q: (dim, inner) -> (heads, dim, dim_head), scale folded
    w_q = (p["to_q_w"] * scale).reshape(dim, heads, dim_head).transpose(1, 0, 2)
    # to_kv: (dim, 2*inner) -> (2, heads, dim, dim_head)
    w_kv = p["to_kv_w"].reshape(dim, 2, heads, dim_head).transpose(1, 2, 0, 3)
    # to_out weights: (inner, dim) -> (heads, dim_head, dim)  (concat(h) @ W == sum_h o_h @ W[h])
    w_sa_out = p["sa_out_w"].reshape(heads, dim_head, dim)
    w_ca_out = p["ca_out_w"].reshape(heads, dim_head, dim)
    # pack the six small vectors into one (8, dim) tile -> single DMA
    vecs = jnp.zeros((8, dim), jnp.float32)
    vecs = (vecs.at[0].set(p["ln1_g"]).at[1].set(p["ln1_b"])
                .at[2].set(p["ln2_g"]).at[3].set(p["ln2_b"])
                .at[4].set(p["sa_out_b"]).at[5].set(p["ca_out_b"]))
    return dict(w_qkv=w_qkv, w_q=w_q, w_kv=w_kv,
                w_sa_out=w_sa_out, w_ca_out=w_ca_out, vecs=vecs)


# ---------------------------------------------------------------------------
# wrapper
# ---------------------------------------------------------------------------
def cross_attention(x, q_x, prepped, *, heads):
    """CrossAttention.forward(x, q_x) -> (out, q_in), fully fused in one pallas_call."""
    B, N, dim = x.shape
    _, Nq, _ = q_x.shape

    kernel = partial(_cross_attention_kernel, B=B, N=N, Nq=Nq, heads=heads)
    vmem = pl.BlockSpec(memory_space=pltpu.MemorySpace.VMEM)   # whole array resident in VMEM

    merged = pl.pallas_call(
        kernel,
        out_shape=jax.ShapeDtypeStruct((2, B * Nq, dim), jnp.float32),
        in_specs=[vmem] * 8,
        out_specs=vmem,
        compiler_params=pltpu.CompilerParams(vmem_limit_bytes=32 * 1024 * 1024),
    )(x.reshape(B * N, dim), q_x.reshape(B * Nq, dim),
      prepped["vecs"], prepped["w_qkv"], prepped["w_sa_out"],
      prepped["w_q"], prepped["w_kv"], prepped["w_ca_out"])

    out = merged[0].reshape(B, Nq, dim)
    q_in = merged[1].reshape(B, Nq, dim)
    return out, q_in


# ---------------------------------------------------------------------------
# pure-JAX reference (mirrors the PyTorch module exactly; uses raw params)
# ---------------------------------------------------------------------------
def cross_attention_ref(x, q_x, p, *, heads, dim_head):
    scale = dim_head ** -0.5

    def ln(v, g, b):
        m = v.mean(-1, keepdims=True)
        var = ((v - m) ** 2).mean(-1, keepdims=True)
        return (v - m) / jnp.sqrt(var + 1e-5) * g + b

    def split(t):   # (B, N, H*d) -> (B, H, N, d)
        B, N, _ = t.shape
        return t.reshape(B, N, heads, dim_head).transpose(0, 2, 1, 3)

    def merge(t):   # (B, H, N, d) -> (B, N, H*d)
        B, H, N, d = t.shape
        return t.transpose(0, 2, 1, 3).reshape(B, N, H * d)

    def attn(q, k, v):
        s = jnp.einsum('bhqd,bhkd->bhqk', q, k) * scale
        return jnp.einsum('bhqk,bhkd->bhqd', jax.nn.softmax(s, axis=-1), v)

    qxn = ln(q_x, p["ln1_g"], p["ln1_b"])
    qkv = qxn @ p["qkv_w"]
    q, k, v = jnp.split(qkv, 3, axis=-1)
    sa = merge(attn(split(q), split(k), split(v))) @ p["sa_out_w"] + p["sa_out_b"]
    q_in = ln(sa + q_x, p["ln2_g"], p["ln2_b"])

    q_c = q_in @ p["to_q_w"]
    kv = x @ p["to_kv_w"]
    k_c, v_c = jnp.split(kv, 2, axis=-1)
    out = merge(attn(split(q_c), split(k_c), split(v_c))) @ p["ca_out_w"] + p["ca_out_b"]
    return out, q_in


# ---------------------------------------------------------------------------
def _uniform(key, shape, bound):
    return jax.random.uniform(key, shape, jnp.float32, -bound, bound)


def init_params(key, dim, heads, dim_head):
    inner = heads * dim_head
    ks = jax.random.split(key, 7)
    return dict(
        ln1_g=jnp.ones((dim,), jnp.float32), ln1_b=jnp.zeros((dim,), jnp.float32),
        qkv_w=_uniform(ks[0], (dim, 3 * inner), 1.0 / math.sqrt(dim)),
        sa_out_w=_uniform(ks[1], (inner, dim), 1.0 / math.sqrt(inner)),
        sa_out_b=_uniform(ks[2], (dim,), 1.0 / math.sqrt(inner)),
        ln2_g=jnp.ones((dim,), jnp.float32), ln2_b=jnp.zeros((dim,), jnp.float32),
        to_q_w=_uniform(ks[3], (dim, inner), 1.0 / math.sqrt(dim)),
        to_kv_w=_uniform(ks[4], (dim, 2 * inner), 1.0 / math.sqrt(dim)),
        ca_out_w=_uniform(ks[5], (inner, dim), 1.0 / math.sqrt(inner)),
        ca_out_b=_uniform(ks[6], (dim,), 1.0 / math.sqrt(inner)),
    )


if __name__ == "__main__":
    B, N, Nq = 2, 16, 8          # x: encoder tokens, q_x: query tokens
    dim, heads, dim_head = 32, 2, 16

    key = jax.random.PRNGKey(0)
    k_x, k_q, k_p = jax.random.split(key, 3)
    x = jax.random.normal(k_x, (B, N, dim), jnp.float32)
    q_x = jax.random.normal(k_q, (B, Nq, dim), jnp.float32)
    params = init_params(k_p, dim, heads, dim_head)
    prepped = prepare_params(params, dim=dim, heads=heads, dim_head=dim_head)

    out, q_in = cross_attention(x, q_x, prepped, heads=heads)
    out = jax.block_until_ready(out)
    q_in = jax.block_until_ready(q_in)

    assert out.shape == (B, Nq, dim) and q_in.shape == (B, Nq, dim)
    assert bool(jnp.all(jnp.isfinite(out))) and bool(jnp.all(jnp.isfinite(q_in)))

    # correctness vs pure-JAX reference (approx reciprocal only in the final softmax)
    out_r, q_in_r = cross_attention_ref(x, q_x, params, heads=heads, dim_head=dim_head)
    err = max(float(jnp.max(jnp.abs(out - out_r))), float(jnp.max(jnp.abs(q_in - q_in_r))))
    assert err < 2e-2, f"max abs err {err}"

    print("KERNEL_OK")
</pallas_src>

<mosaic_0001>
module attributes {stable_mosaic.version = 11 : i64} {
  func.func @_cross_attention_kernel(%arg0: memref<32x32xf32, #tpu.memory_space<vmem>>, %arg1: memref<16x32xf32, #tpu.memory_space<vmem>>, %arg2: memref<8x32xf32, #tpu.memory_space<vmem>>, %arg3: memref<3x2x32x16xf32, #tpu.memory_space<vmem>>, %arg4: memref<2x16x32xf32, #tpu.memory_space<vmem>>, %arg5: memref<2x32x16xf32, #tpu.memory_space<vmem>>, %arg6: memref<2x2x32x16xf32, #tpu.memory_space<vmem>>, %arg7: memref<2x16x32xf32, #tpu.memory_space<vmem>>, %arg8: memref<2x16x32xf32, #tpu.memory_space<vmem>>) attributes {dimension_semantics = [], scalar_prefetch = 0 : i64, scratch_operands = 0 : i64, tpu.core_type = #tpu.core_type<tc>} {
    %c0 = arith.constant 0 : index
    %c0_0 = arith.constant 0 : index
    %0 = vector.load %arg0[%c0, %c0_0] : memref<32x32xf32, #tpu.memory_space<vmem>>, vector<32x32xf32>
    %c0_1 = arith.constant 0 : index
    %c0_2 = arith.constant 0 : index
    %1 = vector.load %arg1[%c0_1, %c0_2] : memref<16x32xf32, #tpu.memory_space<vmem>>, vector<16x32xf32>
    %c0_3 = arith.constant 0 : index
    %c0_4 = arith.constant 0 : index
    %2 = vector.load %arg2[%c0_3, %c0_4] : memref<8x32xf32, #tpu.memory_space<vmem>>, vector<1x32xf32>
    %c1 = arith.constant 1 : index
    %c0_5 = arith.constant 0 : index
    %3 = vector.load %arg2[%c1, %c0_5] : memref<8x32xf32, #tpu.memory_space<vmem>>, vector<1x32xf32>
    %cst = arith.constant dense<0.000000e+00> : vector<16xf32>
    %4 = vector.multi_reduction <add>, %1, %cst [1] : vector<16x32xf32> to vector<16xf32>
    %5 = vector.shape_cast %4 : vector<16xf32> to vector<16x1xf32>
    %cst_6 = arith.constant 3.200000e+01 : f32
    %6 = vector.broadcast %cst_6 : f32 to vector<16x1xf32>
    %7 = arith.divf %5, %6 : vector<16x1xf32>
    %8 = vector.broadcast %7 : vector<16x1xf32> to vector<16x32xf32>
    %9 = arith.subf %1, %8 : vector<16x32xf32>
    %10 = arith.mulf %9, %9 : vector<16x32xf32>
    %cst_7 = arith.constant dense<0.000000e+00> : vector<16xf32>
    %11 = vector.multi_reduction <add>, %10, %cst_7 [1] : vector<16x32xf32> to vector<16xf32>
    %12 = vector.shape_cast %11 : vector<16xf32> to vector<16x1xf32>
    %cst_8 = arith.constant 3.200000e+01 : f32
    %13 = vector.broadcast %cst_8 : f32 to vector<16x1xf32>
    %14 = arith.divf %12, %13 : vector<16x1xf32>
    %cst_9 = arith.constant 9.99999974E-6 : f32
    %15 = vector.broadcast %cst_9 : f32 to vector<16x1xf32>
    %16 = arith.addf %14, %15 : vector<16x1xf32>
    %17 = math.rsqrt %16 : vector<16x1xf32>
    %18 = vector.broadcast %17 : vector<16x1xf32> to vector<16x32xf32>
    %19 = arith.mulf %9, %18 : vector<16x32xf32>
    %20 = vector.broadcast %2 : vector<1x32xf32> to vector<16x32xf32>
    %21 = arith.mulf %19, %20 : vector<16x32xf32>
    %22 = vector.broadcast %3 : vector<1x32xf32> to vector<16x32xf32>
    %23 = arith.addf %21, %22 : vector<16x32xf32>
    %c4 = arith.constant 4 : index
    %c0_10 = arith.constant 0 : index
    %24 = vector.load %arg2[%c4, %c0_10] : memref<8x32xf32, #tpu.memory_space<vmem>>, vector<1x32xf32>
    %c0_11 = arith.constant 0 : index
    %c0_12 = arith.constant 0 : index
    %c0_13 = arith.constant 0 : index
    %c0_14 = arith.constant 0 : index
    %25 = vector.load %arg3[%c0_11, %c0_12, %c0_13, %c0_14] : memref<3x2x32x16xf32, #tpu.memory_space<vmem>>, vector<1x1x32x16xf32>
    %26 = vector.shape_cast %25 : vector<1x1x32x16xf32> to vector<32x16xf32>
    %cst_15 = arith.constant dense<0.000000e+00> : vector<16x16xf32>
    %27 = tpu.matmul %23, %26, %cst_15 {dimension_numbers = #tpu.dot_dimension_numbers<[1], [0], [0], [1], [0, 0, 1, 1], [], []>} : vector<16x32xf32>, vector<32x16xf32>, vector<16x16xf32> -> vector<16x16xf32>
    %c1_16 = arith.constant 1 : index
    %c0_17 = arith.constant 0 : index
    %c0_18 = arith.constant 0 : index
    %c0_19 = arith.constant 0 : index
    %28 = vector.load %arg3[%c1_16, %c0_17, %c0_18, %c0_19] : memref<3x2x32x16xf32, #tpu.memory_space<vmem>>, vector<1x1x32x16xf32>
    %29 = vector.shape_cast %28 : vector<1x1x32x16xf32> to vector<32x16xf32>
    %cst_20 = arith.constant dense<0.000000e+00> : vector<16x16xf32>
    %30 = tpu.matmul %23, %29, %cst_20 {dimension_numbers = #tpu.dot_dimension_numbers<[1], [0], [0], [1], [0, 0, 1, 1], [], []>} : vector<16x32xf32>, vector<32x16xf32>, vector<16x16xf32> -> vector<16x16xf32>
    %c2 = arith.constant 2 : index
    %c0_21 = arith.constant 0 : index
    %c0_22 = arith.constant 0 : index
    %c0_23 = arith.constant 0 : index
    %31 = vector.load %arg3[%c2, %c0_21, %c0_22, %c0_23] : memref<3x2x32x16xf32, #tpu.memory_space<vmem>>, vector<1x1x32x16xf32>
    %32 = vector.shape_cast %31 : vector<1x1x32x16xf32> to vector<32x16xf32>
    %cst_24 = arith.constant dense<0.000000e+00> : vector<16x16xf32>
    %33 = tpu.matmul %23, %32, %cst_24 {dimension_numbers = #tpu.dot_dimension_numbers<[1], [0], [0], [1], [0, 0, 1, 1], [], []>} : vector<16x32xf32>, vector<32x16xf32>, vector<16x16xf32> -> vector<16x16xf32>
    %34 = vector.extract_strided_slice %27 {offsets = [0, 0], sizes = [8, 16], strides = [1, 1]} : vector<16x16xf32> to vector<8x16xf32>
    %35 = vector.extract_strided_slice %30 {offsets = [0, 0], sizes = [8, 16], strides = [1, 1]} : vector<16x16xf32> to vector<8x16xf32>
    %36 = vector.extract_strided_slice %33 {offsets = [0, 0], sizes = [8, 16], strides = [1, 1]} : vector<16x16xf32> to vector<8x16xf32>
    %cst_25 = arith.constant dense<0.000000e+00> : vector<8x8xf32>
    %37 = tpu.matmul %34, %35, %cst_25 {dimension_numbers = #tpu.dot_dimension_numbers<[1], [1], [0], [0], [0, 0, 1, 0], [], []>} : vector<8x16xf32>, vector<8x16xf32>, vector<8x8xf32> -> vector<8x8xf32>
    %cst_26 = arith.constant dense<0xFF800000> : vector<8xf32>
    %38 = vector.multi_reduction <maximumf>, %37, %cst_26 [1] : vector<8x8xf32> to vector<8xf32>
    %39 = vector.shape_cast %38 : vector<8xf32> to vector<8x1xf32>
    %40 = vector.broadcast %39 : vector<8x1xf32> to vector<8x8xf32>
    %41 = arith.subf %37, %40 : vector<8x8xf32>
    %42 = math.exp %41 : vector<8x8xf32>
    %cst_27 = arith.constant dense<0.000000e+00> : vector<8xf32>
    %43 = vector.multi_reduction <add>, %42, %cst_27 [1] : vector<8x8xf32> to vector<8xf32>
    %44 = vector.shape_cast %43 : vector<8xf32> to vector<8x1xf32>
    %45 = vector.broadcast %44 : vector<8x1xf32> to vector<8x8xf32>
    %46 = arith.divf %42, %45 : vector<8x8xf32>
    %cst_28 = arith.constant dense<0.000000e+00> : vector<8x16xf32>
    %47 = tpu.matmul %46, %36, %cst_28 {dimension_numbers = #tpu.dot_dimension_numbers<[1], [0], [0], [1], [0, 0, 1, 1], [], []>} : vector<8x8xf32>, vector<8x16xf32>, vector<8x16xf32> -> vector<8x16xf32>
    %48 = vector.extract_strided_slice %27 {offsets = [8, 0], sizes = [8, 16], strides = [1, 1]} : vector<16x16xf32> to vector<8x16xf32>
    %49 = vector.extract_strided_slice %30 {offsets = [8, 0], sizes = [8, 16], strides = [1, 1]} : vector<16x16xf32> to vector<8x16xf32>
    %50 = vector.extract_strided_slice %33 {offsets = [8, 0], sizes = [8, 16], strides = [1, 1]} : vector<16x16xf32> to vector<8x16xf32>
    %cst_29 = arith.constant dense<0.000000e+00> : vector<8x8xf32>
    %51 = tpu.matmul %48, %49, %cst_29 {dimension_numbers = #tpu.dot_dimension_numbers<[1], [1], [0], [0], [0, 0, 1, 0], [], []>} : vector<8x16xf32>, vector<8x16xf32>, vector<8x8xf32> -> vector<8x8xf32>
    %cst_30 = arith.constant dense<0xFF800000> : vector<8xf32>
    %52 = vector.multi_reduction <maximumf>, %51, %cst_30 [1] : vector<8x8xf32> to vector<8xf32>
    %53 = vector.shape_cast %52 : vector<8xf32> to vector<8x1xf32>
    %54 = vector.broadcast %53 : vector<8x1xf32> to vector<8x8xf32>
    %55 = arith.subf %51, %54 : vector<8x8xf32>
    %56 = math.exp %55 : vector<8x8xf32>
    %cst_31 = arith.constant dense<0.000000e+00> : vector<8xf32>
    %57 = vector.multi_reduction <add>, %56, %cst_31 [1] : vector<8x8xf32> to vector<8xf32>
    %58 = vector.shape_cast %57 : vector<8xf32> to vector<8x1xf32>
    %59 = vector.broadcast %58 : vector<8x1xf32> to vector<8x8xf32>
    %60 = arith.divf %56, %59 : vector<8x8xf32>
    %cst_32 = arith.constant dense<0.000000e+00> : vector<8x16xf32>
    %61 = tpu.matmul %60, %50, %cst_32 {dimension_numbers = #tpu.dot_dimension_numbers<[1], [0], [0], [1], [0, 0, 1, 1], [], []>} : vector<8x8xf32>, vector<8x16xf32>, vector<8x16xf32> -> vector<8x16xf32>
    %62 = tpu.concatenate %47, %61 in 0 : vector<8x16xf32>, vector<8x16xf32> -> vector<16x16xf32>
    %c0_33 = arith.constant 0 : index
    %c0_34 = arith.constant 0 : index
    %c0_35 = arith.constant 0 : index
    %63 = vector.load %arg4[%c0_33, %c0_34, %c0_35] : memref<2x16x32xf32, #tpu.memory_space<vmem>>, vector<1x16x32xf32>
    %64 = vector.shape_cast %63 : vector<1x16x32xf32> to vector<16x32xf32>
    %cst_36 = arith.constant dense<0.000000e+00> : vector<16x32xf32>
    %65 = tpu.matmul %62, %64, %cst_36 {dimension_numbers = #tpu.dot_dimension_numbers<[1], [0], [0], [1], [0, 0, 1, 1], [], []>} : vector<16x16xf32>, vector<16x32xf32>, vector<16x32xf32> -> vector<16x32xf32>
    %c0_37 = arith.constant 0 : index
    %c1_38 = arith.constant 1 : index
    %c0_39 = arith.constant 0 : index
    %c0_40 = arith.constant 0 : index
    %66 = vector.load %arg3[%c0_37, %c1_38, %c0_39, %c0_40] : memref<3x2x32x16xf32, #tpu.memory_space<vmem>>, vector<1x1x32x16xf32>
    %67 = vector.shape_cast %66 : vector<1x1x32x16xf32> to vector<32x16xf32>
    %cst_41 = arith.constant dense<0.000000e+00> : vector<16x16xf32>
    %68 = tpu.matmul %23, %67, %cst_41 {dimension_numbers = #tpu.dot_dimension_numbers<[1], [0], [0], [1], [0, 0, 1, 1], [], []>} : vector<16x32xf32>, vector<32x16xf32>, vector<16x16xf32> -> vector<16x16xf32>
    %c1_42 = arith.constant 1 : index
    %c1_43 = arith.constant 1 : index
    %c0_44 = arith.constant 0 : index
    %c0_45 = arith.constant 0 : index
    %69 = vector.load %arg3[%c1_42, %c1_43, %c0_44, %c0_45] : memref<3x2x32x16xf32, #tpu.memory_space<vmem>>, vector<1x1x32x16xf32>
    %70 = vector.shape_cast %69 : vector<1x1x32x16xf32> to vector<32x16xf32>
    %cst_46 = arith.constant dense<0.000000e+00> : vector<16x16xf32>
    %71 = tpu.matmul %23, %70, %cst_46 {dimension_numbers = #tpu.dot_dimension_numbers<[1], [0], [0], [1], [0, 0, 1, 1], [], []>} : vector<16x32xf32>, vector<32x16xf32>, vector<16x16xf32> -> vector<16x16xf32>
    %c2_47 = arith.constant 2 : index
    %c1_48 = arith.constant 1 : index
    %c0_49 = arith.constant 0 : index
    %c0_50 = arith.constant 0 : index
    %72 = vector.load %arg3[%c2_47, %c1_48, %c0_49, %c0_50] : memref<3x2x32x16xf32, #tpu.memory_space<vmem>>, vector<1x1x32x16xf32>
    %73 = vector.shape_cast %72 : vector<1x1x32x16xf32> to vector<32x16xf32>
    %cst_51 = arith.constant dense<0.000000e+00> : vector<16x16xf32>
    %74 = tpu.matmul %23, %73, %cst_51 {dimension_numbers = #tpu.dot_dimension_numbers<[1], [0], [0], [1], [0, 0, 1, 1], [], []>} : vector<16x32xf32>, vector<32x16xf32>, vector<16x16xf32> -> vector<16x16xf32>
    %75 = vector.extract_strided_slice %68 {offsets = [0, 0], sizes = [8, 16], strides = [1, 1]} : vector<16x16xf32> to vector<8x16xf32>
    %76 = vector.extract_strided_slice %71 {offsets = [0, 0], sizes = [8, 16], strides = [1, 1]} : vector<16x16xf32> to vector<8x16xf32>
    %77 = vector.extract_strided_slice %74 {offsets = [0, 0], sizes = [8, 16], strides = [1, 1]} : vector<16x16xf32> to vector<8x16xf32>
    %cst_52 = arith.constant dense<0.000000e+00> : vector<8x8xf32>
    %78 = tpu.matmul %75, %76, %cst_52 {dimension_numbers = #tpu.dot_dimension_numbers<[1], [1], [0], [0], [0, 0, 1, 0], [], []>} : vector<8x16xf32>, vector<8x16xf32>, vector<8x8xf32> -> vector<8x8xf32>
    %cst_53 = arith.constant dense<0xFF800000> : vector<8xf32>
    %79 = vector.multi_reduction <maximumf>, %78, %cst_53 [1] : vector<8x8xf32> to vector<8xf32>
    %80 = vector.shape_cast %79 : vector<8xf32> to vector<8x1xf32>
    %81 = vector.broadcast %80 : vector<8x1xf32> to vector<8x8xf32>
    %82 = arith.subf %78, %81 : vector<8x8xf32>
    %83 = math.exp %82 : vector<8x8xf32>
    %cst_54 = arith.constant dense<0.000000e+00> : vector<8xf32>
    %84 = vector.multi_reduction <add>, %83, %cst_54 [1] : vector<8x8xf32> to vector<8xf32>
    %85 = vector.shape_cast %84 : vector<8xf32> to vector<8x1xf32>
    %86 = vector.broadcast %85 : vector<8x1xf32> to vector<8x8xf32>
    %87 = arith.divf %83, %86 : vector<8x8xf32>
    %cst_55 = arith.constant dense<0.000000e+00> : vector<8x16xf32>
    %88 = tpu.matmul %87, %77, %cst_55 {dimension_numbers = #tpu.dot_dimension_numbers<[1], [0], [0], [1], [0, 0, 1, 1], [], []>} : vector<8x8xf32>, vector<8x16xf32>, vector<8x16xf32> -> vector<8x16xf32>
    %89 = vector.extract_strided_slice %68 {offsets = [8, 0], sizes = [8, 16], strides = [1, 1]} : vector<16x16xf32> to vector<8x16xf32>
    %90 = vector.extract_strided_slice %71 {offsets = [8, 0], sizes = [8, 16], strides = [1, 1]} : vector<16x16xf32> to vector<8x16xf32>
    %91 = vector.extract_strided_slice %74 {offsets = [8, 0], sizes = [8, 16], strides = [1, 1]} : vector<16x16xf32> to vector<8x16xf32>
    %cst_56 = arith.constant dense<0.000000e+00> : vector<8x8xf32>
    %92 = tpu.matmul %89, %90, %cst_56 {dimension_numbers = #tpu.dot_dimension_numbers<[1], [1], [0], [0], [0, 0, 1, 0], [], []>} : vector<8x16xf32>, vector<8x16xf32>, vector<8x8xf32> -> vector<8x8xf32>
    %cst_57 = arith.constant dense<0xFF800000> : vector<8xf32>
    %93 = vector.multi_reduction <maximumf>, %92, %cst_57 [1] : vector<8x8xf32> to vector<8xf32>
    %94 = vector.shape_cast %93 : vector<8xf32> to vector<8x1xf32>
    %95 = vector.broadcast %94 : vector<8x1xf32> to vector<8x8xf32>
    %96 = arith.subf %92, %95 : vector<8x8xf32>
    %97 = math.exp %96 : vector<8x8xf32>
    %cst_58 = arith.constant dense<0.000000e+00> : vector<8xf32>
    %98 = vector.multi_reduction <add>, %97, %cst_58 [1] : vector<8x8xf32> to vector<8xf32>
    %99 = vector.shape_cast %98 : vector<8xf32> to vector<8x1xf32>
    %100 = vector.broadcast %99 : vector<8x1xf32> to vector<8x8xf32>
    %101 = arith.divf %97, %100 : vector<8x8xf32>
    %cst_59 = arith.constant dense<0.000000e+00> : vector<8x16xf32>
    %102 = tpu.matmul %101, %91, %cst_59 {dimension_numbers = #tpu.dot_dimension_numbers<[1], [0], [0], [1], [0, 0, 1, 1], [], []>} : vector<8x8xf32>, vector<8x16xf32>, vector<8x16xf32> -> vector<8x16xf32>
    %103 = tpu.concatenate %88, %102 in 0 : vector<8x16xf32>, vector<8x16xf32> -> vector<16x16xf32>
    %c1_60 = arith.constant 1 : index
    %c0_61 = arith.constant 0 : index
    %c0_62 = arith.constant 0 : index
    %104 = vector.load %arg4[%c1_60, %c0_61, %c0_62] : memref<2x16x32xf32, #tpu.memory_space<vmem>>, vector<1x16x32xf32>
    %105 = vector.shape_cast %104 : vector<1x16x32xf32> to vector<16x32xf32>
    %cst_63 = arith.constant dense<0.000000e+00> : vector<16x32xf32>
    %106 = tpu.matmul %103, %105, %cst_63 {dimension_numbers = #tpu.dot_dimension_numbers<[1], [0], [0], [1], [0, 0, 1, 1], [], []>} : vector<16x16xf32>, vector<16x32xf32>, vector<16x32xf32> -> vector<16x32xf32>
    %107 = arith.addf %65, %106 : vector<16x32xf32>
    %108 = vector.broadcast %24 : vector<1x32xf32> to vector<16x32xf32>
    %109 = arith.addf %107, %108 : vector<16x32xf32>
    %110 = arith.addf %109, %1 : vector<16x32xf32>
    %c2_64 = arith.constant 2 : index
    %c0_65 = arith.constant 0 : index
    %111 = vector.load %arg2[%c2_64, %c0_65] : memref<8x32xf32, #tpu.memory_space<vmem>>, vector<1x32xf32>
    %c3 = arith.constant 3 : index
    %c0_66 = arith.constant 0 : index
    %112 = vector.load %arg2[%c3, %c0_66] : memref<8x32xf32, #tpu.memory_space<vmem>>, vector<1x32xf32>
    %cst_67 = arith.constant dense<0.000000e+00> : vector<16xf32>
    %113 = vector.multi_reduction <add>, %110, %cst_67 [1] : vector<16x32xf32> to vector<16xf32>
    %114 = vector.shape_cast %113 : vector<16xf32> to vector<16x1xf32>
    %cst_68 = arith.constant 3.200000e+01 : f32
    %115 = vector.broadcast %cst_68 : f32 to vector<16x1xf32>
    %116 = arith.divf %114, %115 : vector<16x1xf32>
    %117 = vector.broadcast %116 : vector<16x1xf32> to vector<16x32xf32>
    %118 = arith.subf %110, %117 : vector<16x32xf32>
    %119 = arith.mulf %118, %118 : vector<16x32xf32>
    %cst_69 = arith.constant dense<0.000000e+00> : vector<16xf32>
    %120 = vector.multi_reduction <add>, %119, %cst_69 [1] : vector<16x32xf32> to vector<16xf32>
    %121 = vector.shape_cast %120 : vector<16xf32> to vector<16x1xf32>
    %cst_70 = arith.constant 3.200000e+01 : f32
    %122 = vector.broadcast %cst_70 : f32 to vector<16x1xf32>
    %123 = arith.divf %121, %122 : vector<16x1xf32>
    %cst_71 = arith.constant 9.99999974E-6 : f32
    %124 = vector.broadcast %cst_71 : f32 to vector<16x1xf32>
    %125 = arith.addf %123, %124 : vector<16x1xf32>
    %126 = math.rsqrt %125 : vector<16x1xf32>
    %127 = vector.broadcast %126 : vector<16x1xf32> to vector<16x32xf32>
    %128 = arith.mulf %118, %127 : vector<16x32xf32>
    %129 = vector.broadcast %111 : vector<1x32xf32> to vector<16x32xf32>
    %130 = arith.mulf %128, %129 : vector<16x32xf32>
    %131 = vector.broadcast %112 : vector<1x32xf32> to vector<16x32xf32>
    %132 = arith.addf %130, %131 : vector<16x32xf32>
    %c5 = arith.constant 5 : index
    %c0_72 = arith.constant 0 : index
    %133 = vector.load %arg2[%c5, %c0_72] : memref<8x32xf32, #tpu.memory_space<vmem>>, vector<1x32xf32>
    %c0_73 = arith.constant 0 : index
    %c0_74 = arith.constant 0 : index
    %c0_75 = arith.constant 0 : index
    %134 = vector.load %arg5[%c0_73, %c0_74, %c0_75] : memref<2x32x16xf32, #tpu.memory_space<vmem>>, vector<1x32x16xf32>
    %135 = vector.shape_cast %134 : vector<1x32x16xf32> to vector<32x16xf32>
    %cst_76 = arith.constant dense<0.000000e+00> : vector<16x16xf32>
    %136 = tpu.matmul %132, %135, %cst_76 {dimension_numbers = #tpu.dot_dimension_numbers<[1], [0], [0], [1], [0, 0, 1, 1], [], []>} : vector<16x32xf32>, vector<32x16xf32>, vector<16x16xf32> -> vector<16x16xf32>
    %c0_77 = arith.constant 0 : index
    %c0_78 = arith.constant 0 : index
    %c0_79 = arith.constant 0 : index
    %c0_80 = arith.constant 0 : index
    %137 = vector.load %arg6[%c0_77, %c0_78, %c0_79, %c0_80] : memref<2x2x32x16xf32, #tpu.memory_space<vmem>>, vector<1x1x32x16xf32>
    %138 = vector.shape_cast %137 : vector<1x1x32x16xf32> to vector<32x16xf32>
    %cst_81 = arith.constant dense<0.000000e+00> : vector<32x16xf32>
    %139 = tpu.matmul %0, %138, %cst_81 {dimension_numbers = #tpu.dot_dimension_numbers<[1], [0], [0], [1], [0, 0, 1, 1], [], []>} : vector<32x32xf32>, vector<32x16xf32>, vector<32x16xf32> -> vector<32x16xf32>
    %c1_82 = arith.constant 1 : index
    %c0_83 = arith.constant 0 : index
    %c0_84 = arith.constant 0 : index
    %c0_85 = arith.constant 0 : index
    %140 = vector.load %arg6[%c1_82, %c0_83, %c0_84, %c0_85] : memref<2x2x32x16xf32, #tpu.memory_space<vmem>>, vector<1x1x32x16xf32>
    %141 = vector.shape_cast %140 : vector<1x1x32x16xf32> to vector<32x16xf32>
    %cst_86 = arith.constant dense<0.000000e+00> : vector<32x16xf32>
    %142 = tpu.matmul %0, %141, %cst_86 {dimension_numbers = #tpu.dot_dimension_numbers<[1], [0], [0], [1], [0, 0, 1, 1], [], []>} : vector<32x32xf32>, vector<32x16xf32>, vector<32x16xf32> -> vector<32x16xf32>
    %143 = vector.extract_strided_slice %136 {offsets = [0, 0], sizes = [8, 16], strides = [1, 1]} : vector<16x16xf32> to vector<8x16xf32>
    %144 = vector.extract_strided_slice %139 {offsets = [0, 0], sizes = [16, 16], strides = [1, 1]} : vector<32x16xf32> to vector<16x16xf32>
    %145 = vector.extract_strided_slice %142 {offsets = [0, 0], sizes = [16, 16], strides = [1, 1]} : vector<32x16xf32> to vector<16x16xf32>
    %cst_87 = arith.constant dense<0.000000e+00> : vector<8x16xf32>
    %146 = tpu.matmul %143, %144, %cst_87 {dimension_numbers = #tpu.dot_dimension_numbers<[1], [1], [0], [0], [0, 0, 1, 0], [], []>} : vector<8x16xf32>, vector<16x16xf32>, vector<8x16xf32> -> vector<8x16xf32>
    %cst_88 = arith.constant dense<0xFF800000> : vector<8xf32>
    %147 = vector.multi_reduction <maximumf>, %146, %cst_88 [1] : vector<8x16xf32> to vector<8xf32>
    %148 = vector.shape_cast %147 : vector<8xf32> to vector<8x1xf32>
    %149 = vector.broadcast %148 : vector<8x1xf32> to vector<8x16xf32>
    %150 = arith.subf %146, %149 : vector<8x16xf32>
    %151 = math.exp %150 : vector<8x16xf32>
    %cst_89 = arith.constant dense<0.000000e+00> : vector<8xf32>
    %152 = vector.multi_reduction <add>, %151, %cst_89 [1] : vector<8x16xf32> to vector<8xf32>
    %153 = vector.shape_cast %152 : vector<8xf32> to vector<8x1xf32>
    %154 = tpu.reciprocal %153 {approx = true} : vector<8x1xf32> -> vector<8x1xf32>
    %155 = vector.broadcast %154 : vector<8x1xf32> to vector<8x16xf32>
    %156 = arith.mulf %151, %155 : vector<8x16xf32>
    %cst_90 = arith.constant dense<0.000000e+00> : vector<8x16xf32>
    %157 = tpu.matmul %156, %145, %cst_90 {dimension_numbers = #tpu.dot_dimension_numbers<[1], [0], [0], [1], [0, 0, 1, 1], [], []>} : vector<8x16xf32>, vector<16x16xf32>, vector<8x16xf32> -> vector<8x16xf32>
    %158 = vector.extract_strided_slice %136 {offsets = [8, 0], sizes = [8, 16], strides = [1, 1]} : vector<16x16xf32> to vector<8x16xf32>
    %159 = vector.extract_strided_slice %139 {offsets = [16, 0], sizes = [16, 16], strides = [1, 1]} : vector<32x16xf32> to vector<16x16xf32>
    %160 = vector.extract_strided_slice %142 {offsets = [16, 0], sizes = [16, 16], strides = [1, 1]} : vector<32x16xf32> to vector<16x16xf32>
    %cst_91 = arith.constant dense<0.000000e+00> : vector<8x16xf32>
    %161 = tpu.matmul %158, %159, %cst_91 {dimension_numbers = #tpu.dot_dimension_numbers<[1], [1], [0], [0], [0, 0, 1, 0], [], []>} : vector<8x16xf32>, vector<16x16xf32>, vector<8x16xf32> -> vector<8x16xf32>
    %cst_92 = arith.constant dense<0xFF800000> : vector<8xf32>
    %162 = vector.multi_reduction <maximumf>, %161, %cst_92 [1] : vector<8x16xf32> to vector<8xf32>
    %163 = vector.shape_cast %162 : vector<8xf32> to vector<8x1xf32>
    %164 = vector.broadcast %163 : vector<8x1xf32> to vector<8x16xf32>
    %165 = arith.subf %161, %164 : vector<8x16xf32>
    %166 = math.exp %165 : vector<8x16xf32>
    %cst_93 = arith.constant dense<0.000000e+00> : vector<8xf32>
    %167 = vector.multi_reduction <add>, %166, %cst_93 [1] : vector<8x16xf32> to vector<8xf32>
    %168 = vector.shape_cast %167 : vector<8xf32> to vector<8x1xf32>
    %169 = tpu.reciprocal %168 {approx = true} : vector<8x1xf32> -> vector<8x1xf32>
    %170 = vector.broadcast %169 : vector<8x1xf32> to vector<8x16xf32>
    %171 = arith.mulf %166, %170 : vector<8x16xf32>
    %cst_94 = arith.constant dense<0.000000e+00> : vector<8x16xf32>
    %172 = tpu.matmul %171, %160, %cst_94 {dimension_numbers = #tpu.dot_dimension_numbers<[1], [0], [0], [1], [0, 0, 1, 1], [], []>} : vector<8x16xf32>, vector<16x16xf32>, vector<8x16xf32> -> vector<8x16xf32>
    %173 = tpu.concatenate %157, %172 in 0 : vector<8x16xf32>, vector<8x16xf32> -> vector<16x16xf32>
    %c0_95 = arith.constant 0 : index
    %c0_96 = arith.constant 0 : index
    %c0_97 = arith.constant 0 : index
    %174 = vector.load %arg7[%c0_95, %c0_96, %c0_97] : memref<2x16x32xf32, #tpu.memory_space<vmem>>, vector<1x16x32xf32>
    %175 = vector.shape_cast %174 : vector<1x16x32xf32> to vector<16x32xf32>
    %cst_98 = arith.constant dense<0.000000e+00> : vector<16x32xf32>
    %176 = tpu.matmul %173, %175, %cst_98 {dimension_numbers = #tpu.dot_dimension_numbers<[1], [0], [0], [1], [0, 0, 1, 1], [], []>} : vector<16x16xf32>, vector<16x32xf32>, vector<16x32xf32> -> vector<16x32xf32>
    %c1_99 = arith.constant 1 : index
    %c0_100 = arith.constant 0 : index
    %c0_101 = arith.constant 0 : index
    %177 = vector.load %arg5[%c1_99, %c0_100, %c0_101] : memref<2x32x16xf32, #tpu.memory_space<vmem>>, vector<1x32x16xf32>
    %178 = vector.shape_cast %177 : vector<1x32x16xf32> to vector<32x16xf32>
    %cst_102 = arith.constant dense<0.000000e+00> : vector<16x16xf32>
    %179 = tpu.matmul %132, %178, %cst_102 {dimension_numbers = #tpu.dot_dimension_numbers<[1], [0], [0], [1], [0, 0, 1, 1], [], []>} : vector<16x32xf32>, vector<32x16xf32>, vector<16x16xf32> -> vector<16x16xf32>
    %c0_103 = arith.constant 0 : index
    %c1_104 = arith.constant 1 : index
    %c0_105 = arith.constant 0 : index
    %c0_106 = arith.constant 0 : index
    %180 = vector.load %arg6[%c0_103, %c1_104, %c0_105, %c0_106] : memref<2x2x32x16xf32, #tpu.memory_space<vmem>>, vector<1x1x32x16xf32>
    %181 = vector.shape_cast %180 : vector<1x1x32x16xf32> to vector<32x16xf32>
    %cst_107 = arith.constant dense<0.000000e+00> : vector<32x16xf32>
    %182 = tpu.matmul %0, %181, %cst_107 {dimension_numbers = #tpu.dot_dimension_numbers<[1], [0], [0], [1], [0, 0, 1, 1], [], []>} : vector<32x32xf32>, vector<32x16xf32>, vector<32x16xf32> -> vector<32x16xf32>
    %c1_108 = arith.constant 1 : index
    %c1_109 = arith.constant 1 : index
    %c0_110 = arith.constant 0 : index
    %c0_111 = arith.constant 0 : index
    %183 = vector.load %arg6[%c1_108, %c1_109, %c0_110, %c0_111] : memref<2x2x32x16xf32, #tpu.memory_space<vmem>>, vector<1x1x32x16xf32>
    %184 = vector.shape_cast %183 : vector<1x1x32x16xf32> to vector<32x16xf32>
    %cst_112 = arith.constant dense<0.000000e+00> : vector<32x16xf32>
    %185 = tpu.matmul %0, %184, %cst_112 {dimension_numbers = #tpu.dot_dimension_numbers<[1], [0], [0], [1], [0, 0, 1, 1], [], []>} : vector<32x32xf32>, vector<32x16xf32>, vector<32x16xf32> -> vector<32x16xf32>
    %186 = vector.extract_strided_slice %179 {offsets = [0, 0], sizes = [8, 16], strides = [1, 1]} : vector<16x16xf32> to vector<8x16xf32>
    %187 = vector.extract_strided_slice %182 {offsets = [0, 0], sizes = [16, 16], strides = [1, 1]} : vector<32x16xf32> to vector<16x16xf32>
    %188 = vector.extract_strided_slice %185 {offsets = [0, 0], sizes = [16, 16], strides = [1, 1]} : vector<32x16xf32> to vector<16x16xf32>
    %cst_113 = arith.constant dense<0.000000e+00> : vector<8x16xf32>
    %189 = tpu.matmul %186, %187, %cst_113 {dimension_numbers = #tpu.dot_dimension_numbers<[1], [1], [0], [0], [0, 0, 1, 0], [], []>} : vector<8x16xf32>, vector<16x16xf32>, vector<8x16xf32> -> vector<8x16xf32>
    %cst_114 = arith.constant dense<0xFF800000> : vector<8xf32>
    %190 = vector.multi_reduction <maximumf>, %189, %cst_114 [1] : vector<8x16xf32> to vector<8xf32>
    %191 = vector.shape_cast %190 : vector<8xf32> to vector<8x1xf32>
    %192 = vector.broadcast %191 : vector<8x1xf32> to vector<8x16xf32>
    %193 = arith.subf %189, %192 : vector<8x16xf32>
    %194 = math.exp %193 : vector<8x16xf32>
    %cst_115 = arith.constant dense<0.000000e+00> : vector<8xf32>
    %195 = vector.multi_reduction <add>, %194, %cst_115 [1] : vector<8x16xf32> to vector<8xf32>
    %196 = vector.shape_cast %195 : vector<8xf32> to vector<8x1xf32>
    %197 = tpu.reciprocal %196 {approx = true} : vector<8x1xf32> -> vector<8x1xf32>
    %198 = vector.broadcast %197 : vector<8x1xf32> to vector<8x16xf32>
    %199 = arith.mulf %194, %198 : vector<8x16xf32>
    %cst_116 = arith.constant dense<0.000000e+00> : vector<8x16xf32>
    %200 = tpu.matmul %199, %188, %cst_116 {dimension_numbers = #tpu.dot_dimension_numbers<[1], [0], [0], [1], [0, 0, 1, 1], [], []>} : vector<8x16xf32>, vector<16x16xf32>, vector<8x16xf32> -> vector<8x16xf32>
    %201 = vector.extract_strided_slice %179 {offsets = [8, 0], sizes = [8, 16], strides = [1, 1]} : vector<16x16xf32> to vector<8x16xf32>
    %202 = vector.extract_strided_slice %182 {offsets = [16, 0], sizes = [16, 16], strides = [1, 1]} : vector<32x16xf32> to vector<16x16xf32>
    %203 = vector.extract_strided_slice %185 {offsets = [16, 0], sizes = [16, 16], strides = [1, 1]} : vector<32x16xf32> to vector<16x16xf32>
    %cst_117 = arith.constant dense<0.000000e+00> : vector<8x16xf32>
    %204 = tpu.matmul %201, %202, %cst_117 {dimension_numbers = #tpu.dot_dimension_numbers<[1], [1], [0], [0], [0, 0, 1, 0], [], []>} : vector<8x16xf32>, vector<16x16xf32>, vector<8x16xf32> -> vector<8x16xf32>
    %cst_118 = arith.constant dense<0xFF800000> : vector<8xf32>
    %205 = vector.multi_reduction <maximumf>, %204, %cst_118 [1] : vector<8x16xf32> to vector<8xf32>
    %206 = vector.shape_cast %205 : vector<8xf32> to vector<8x1xf32>
    %207 = vector.broadcast %206 : vector<8x1xf32> to vector<8x16xf32>
    %208 = arith.subf %204, %207 : vector<8x16xf32>
    %209 = math.exp %208 : vector<8x16xf32>
    %cst_119 = arith.constant dense<0.000000e+00> : vector<8xf32>
    %210 = vector.multi_reduction <add>, %209, %cst_119 [1] : vector<8x16xf32> to vector<8xf32>
    %211 = vector.shape_cast %210 : vector<8xf32> to vector<8x1xf32>
    %212 = tpu.reciprocal %211 {approx = true} : vector<8x1xf32> -> vector<8x1xf32>
    %213 = vector.broadcast %212 : vector<8x1xf32> to vector<8x16xf32>
    %214 = arith.mulf %209, %213 : vector<8x16xf32>
    %cst_120 = arith.constant dense<0.000000e+00> : vector<8x16xf32>
    %215 = tpu.matmul %214, %203, %cst_120 {dimension_numbers = #tpu.dot_dimension_numbers<[1], [0], [0], [1], [0, 0, 1, 1], [], []>} : vector<8x16xf32>, vector<16x16xf32>, vector<8x16xf32> -> vector<8x16xf32>
    %216 = tpu.concatenate %200, %215 in 0 : vector<8x16xf32>, vector<8x16xf32> -> vector<16x16xf32>
    %c1_121 = arith.constant 1 : index
    %c0_122 = arith.constant 0 : index
    %c0_123 = arith.constant 0 : index
    %217 = vector.load %arg7[%c1_121, %c0_122, %c0_123] : memref<2x16x32xf32, #tpu.memory_space<vmem>>, vector<1x16x32xf32>
    %218 = vector.shape_cast %217 : vector<1x16x32xf32> to vector<16x32xf32>
    %cst_124 = arith.constant dense<0.000000e+00> : vector<16x32xf32>
    %219 = tpu.matmul %216, %218, %cst_124 {dimension_numbers = #tpu.dot_dimension_numbers<[1], [0], [0], [1], [0, 0, 1, 1], [], []>} : vector<16x16xf32>, vector<16x32xf32>, vector<16x32xf32> -> vector<16x32xf32>
    %220 = arith.addf %176, %219 : vector<16x32xf32>
    %221 = vector.broadcast %133 : vector<1x32xf32> to vector<16x32xf32>
    %222 = arith.addf %220, %221 : vector<16x32xf32>
    %c0_125 = arith.constant 0 : index
    %c0_126 = arith.constant 0 : index
    %c0_127 = arith.constant 0 : index
    %223 = vector.load %arg8[%c0_125, %c0_126, %c0_127] : memref<2x16x32xf32, #tpu.memory_space<vmem>>, vector<1x16x32xf32>
    %224 = vector.shape_cast %223 : vector<1x16x32xf32> to vector<16x32xf32>
    %225 = vector.shape_cast %222 : vector<16x32xf32> to vector<1x16x32xf32>
    tpu.vector_store %arg8[%c0_125, %c0_126, %c0_127], %225 {strides = array<i32>} : memref<2x16x32xf32, #tpu.memory_space<vmem>>, vector<1x16x32xf32>,
    %c1_128 = arith.constant 1 : index
    %c0_129 = arith.constant 0 : index
    %c0_130 = arith.constant 0 : index
    %226 = vector.load %arg8[%c1_128, %c0_129, %c0_130] : memref<2x16x32xf32, #tpu.memory_space<vmem>>, vector<1x16x32xf32>
    %227 = vector.shape_cast %226 : vector<1x16x32xf32> to vector<16x32xf32>
    %228 = vector.shape_cast %132 : vector<16x32xf32> to vector<1x16x32xf32>
    tpu.vector_store %arg8[%c1_128, %c0_129, %c0_130], %228 {strides = array<i32>} : memref<2x16x32xf32, #tpu.memory_space<vmem>>, vector<1x16x32xf32>,
    return
  }
}

</mosaic_0001>

<bundles_post_ra>
// kernel: tpu_custom_call.1
= control target key start
LH: loop header
LB: loop body
LE: loop exit
PB: predicated region body
PF: predicated region fallthrough
CT: control target
= control target key end

     0   :  { %vm38_vm0 = vcmask 261120   ;;  %s3854_s0 = inlined_call_operand.vmem [shape: f32[32,32], index: 0, kind: input, shape index: {}]   ;;  %s3855_s1 = inlined_call_operand.vmem [shape: f32[16,32], index: 1, kind: input, shape index: {}]   ;;  %s3856_s2 = inlined_call_operand.vmem [shape: f32[8,32], index: 2, kind: input, shape index: {}]   ;;  %s3857_s3 = inlined_call_operand.vmem [shape: f32[3,2,32,16], index: 3, kind: input, shape index: {}]   ;;  %s3858_s4 = inlined_call_operand.vmem [shape: f32[2,16,32], index: 4, kind: input, shape index: {}]   ;;  %s3859_s5 = inlined_call_operand.vmem [shape: f32[2,32,16], index: 5, kind: input, shape index: {}]   ;;  %s3860_s6 = inlined_call_operand.vmem [shape: f32[2,2,32,16], index: 6, kind: input, shape index: {}]   ;;  %s3861_s7 = inlined_call_operand.vmem [shape: f32[2,16,32], index: 7, kind: input, shape index: {}]   ;;  %s3862_s8 = inlined_call_operand.hbm [shape: f32[2,16,32], index: 8, kind: output, shape index: {}]  }
   0x1   :  { %v3442_v0 = vld [vmem:[%s3855_s1] sm:$0xff]  ;;  %v3447_v1 = vld [vmem:[%s3855_s1 + $0x8] sm:$0xff] }
   0x2   :  { %13 = vsyncpa [#allocation3], 0  ;;  %v39_v2 = vsel %vm38_vm0, %v3442_v0, 0.0  ;;  %v42_v3 = vsel %vm38_vm0, %v3447_v1, 0.0  ;;  %v82_v14 = vld [vmem:[%s3857_s3 + $0x18] sm:$0xff]  ;;  %v81_v16 = vld [vmem:[%s3857_s3 + $0x10] sm:$0xff] }
   0x3   :  { %40 = vadd.xlane.f32.xlu0 %v39_v2  ;;  %3054 = vmatprep.subr.mxu0 %v82_v14  ;;  %v2811_v15 = vld [vmem:[%s3857_s3 + $0x58] sm:$0xff]  ;;  %v2810_v17 = vld [vmem:[%s3857_s3 + $0x50] sm:$0xff]  ;;  %v80_v18 = vld [vmem:[%s3857_s3 + $0x8] sm:$0xff]  ;;  %v3389_v42 = vmov 0.0   ;;  %vm3390_vm1 = vmmov 0   ;;  %vm324_vm2 = vcmask 130048  }
   0x4   :  { %3055 = vmatpush3.msra.mxu0 %v82_v14  ;;  %3065 = vmatprep.subr.mxu1 %v2811_v15  ;;  %v2809_v19 = vld [vmem:[%s3857_s3 + $0x48] sm:$0xff]  ;;  %v79_v20 = vld [vmem:[%s3857_s3] sm:$0xff]  ;;  %v2817_v22 = vld [vmem:[%s3857_s3 + $0x98] sm:$0xff]  ;;  %vm401_vm3 = vcmask 64512  }
   0x5   :  { %3056 = vmatprep.subr.mxu0 %v81_v16  ;;  %3066 = vmatpush3.msra.mxu1 %v2811_v15  ;;  %v2808_v21 = vld [vmem:[%s3857_s3 + $0x40] sm:$0xff]  ;;  %v2816_v39 = vld [vmem:[%s3857_s3 + $0x90] sm:$0xff]  ;;  %v2815_v40 = vld [vmem:[%s3857_s3 + $0x88] sm:$0xff] }
   0x6   :  { %3057 = vmatpush3.msra.mxu0 %v81_v16  ;;  %3067 = vmatprep.subr.mxu1 %v2810_v17  ;;  %v2804_v30 = vld [vmem:[%s3856_s2] ss:$0 sm:$0xff]  ;;  %v2805_v32 = vld [vmem:[%s3856_s2 + $0x1] ss:$0 sm:$0xff]  ;;  %v2829_v43 = vld [vmem:[%s3857_s3 + $0x38] sm:$0xff] }
   0x7   :  { %43 = vadd.xlane.f32.xlu0 %v42_v3  ;;  %3058 = vmatprep.subr.mxu0 %v80_v18  ;;  %v2814_v41 = vld [vmem:[%s3857_s3 + $0x80] sm:$0xff]  ;;  %v2828_v47 = vld [vmem:[%s3857_s3 + $0x30] sm:$0xff]  ;;  %v2827_v49 = vld [vmem:[%s3857_s3 + $0x28] sm:$0xff] }
   0x8   :  { %3068 = vmatpush3.msra.mxu1 %v2810_v17  ;;  %3059 = vmatpush3.msra.mxu0 %v80_v18  ;;  %v2826_v50 = vld [vmem:[%s3857_s3 + $0x20] sm:$0xff]  ;;  %v2841_v52 = vld [vmem:[%s3857_s3 + $0xb8] sm:$0xff]  ;;  %v2840_v54 = vld [vmem:[%s3857_s3 + $0xb0] sm:$0xff] }
   0x9   :  { %3069 = vmatprep.subr.mxu1 %v2809_v19  ;;  %3060 = vmatprep.subr.mxu0 %v79_v20  ;;  %v2839_v55 = vld [vmem:[%s3857_s3 + $0xa8] sm:$0xff]  ;;  %v2838_v56 = vld [vmem:[%s3857_s3 + $0xa0] sm:$0xff]  ;;  %v2835_v16 = vld [vmem:[%s3857_s3 + $0x78] sm:$0xff] }
   0xa   :  { %3070 = vmatpush3.msra.mxu1 %v2809_v19  ;;  %3061 = vmatpush3.msra.mxu0 %v79_v20  ;;  %v2834_v18 = vld [vmem:[%s3857_s3 + $0x70] sm:$0xff]  ;;  %v2833_v19 = vld [vmem:[%s3857_s3 + $0x68] sm:$0xff]  ;;  %v2832_v20 = vld [vmem:[%s3857_s3 + $0x60] sm:$0xff] }
   0xb   :  { %3071 = vmatprep.subr.mxu1 %v2808_v21  ;;  %3076 = vmatprep.subr.mxu0 %v2817_v22 }
   0xc   :  { %3072 = vmatpush3.msra.mxu1 %v2808_v21 }
   0xd   :  { %3087 = vmatprep.subr.mxu1 %v3389_v42 }
  0x8c   :  { %v41_v4 = vpop.xlane.xlu0 %40 }
  0x8d   :  { %v46_v5 = vmul.f32 0.03125, %v41_v4 }
  0x8f   :  { %v48_v6 = vsub.f32 %v3442_v0, %v46_v5 }
  0x90   :  { %v44_v7 = vpop.xlane.xlu0 %43 }
  0x91   :  { %v47_v8 = vmul.f32 0.03125, %v44_v7  ;;  %v50_v9 = vmul.f32 %v48_v6, %v48_v6 }
  0x93   :  { %v49_v10 = vsub.f32 %v3447_v1, %v47_v8  ;;  %v52_v11 = vsel %vm38_vm0, %v50_v9, 0.0 }
  0x94   :  { %53 = vadd.xlane.f32.xlu1 %v52_v11 }
  0x95   :  { %v51_v12 = vmul.f32 %v49_v10, %v49_v10 }
  0x97   :  { %v55_v13 = vsel %vm38_vm0, %v51_v12, 0.0 }
  0x98   :  { %56 = vadd.xlane.f32.xlu1 %v55_v13 }
 0x11d   :  { %v54_v23 = vpop.xlane.xlu1 %53 }
 0x11e   :  { %v58_v24 = vmul.f32 0.03125, %v54_v23 }
 0x120   :  { %v60_v25 = vadd.f32 1e-05, %v58_v24 }
 0x121   :  { %v57_v26 = vpop.xlane.xlu1 %56 }
 0x122   :  { %3327 = vrsqrt.f32 %v60_v25  ;;  %v59_v27 = vmul.f32 0.03125, %v57_v26 }
 0x124   :  { %v61_v28 = vadd.f32 1e-05, %v59_v27 }
 0x126   :  { %3329 = vrsqrt.f32 %v61_v28 }
 0x12f   :  { %v3328_v29 = vpop.eup %3327 }
 0x130   :  { %v64_v31 = vmul.f32 %v3328_v29, %v48_v6 }
 0x132   :  { %v70_v33 = vmul.f32 %v2804_v30, %v64_v31 }
 0x133   :  { %v3330_v34 = vpop.eup %3329 }
 0x134   :  { %v65_v35 = vmul.f32 %v3330_v34, %v49_v10  ;;  %v3490_v36 = vadd.f32 %v2805_v32, %v70_v33 }
 0x136   :  { %v71_v37 = vmul.f32 %v2804_v30, %v65_v35  ;;  %3062 = vmatprep.mubr.msk.f32.mxu0 %vm38_vm0, %v3490_v36  ;;  %3073 = vmatprep.mubr.msk.f32.mxu1 %vm38_vm0, %v3490_v36 }
 0x138   :  { %v3496_v38 = vadd.f32 %v2805_v32, %v71_v37 }
 0x13a   :  { %3063 = vmatmul.mubr.msk.f32.vlgmr.msra.gmra.mxu0 %vm38_vm0, %v3496_v38  ;;  %3074 = vmatmul.mubr.msk.f32.vlgmr.msra.gmra.mxu1 %vm38_vm0, %v3496_v38 }
 0x13b   :  { %3077 = vmatpush3.msra.mxu0 %v2817_v22  ;;  %3084 = vmatprep.mubr.msk.f32.mxu0 %vm38_vm0, %v3490_v36 }
 0x13c   :  { %3078 = vmatprep.subr.mxu0 %v2816_v39  ;;  %3089 = vmatprep.mubr.msk.f32.mxu1 %vm3390_vm1, %v3389_v42 }
 0x13d   :  { %3079 = vmatpush3.msra.mxu0 %v2816_v39 }
 0x13e   :  { %3080 = vmatprep.subr.mxu0 %v2815_v40 }
 0x13f   :  { %3081 = vmatpush3.msra.mxu0 %v2815_v40 }
 0x140   :  { %3082 = vmatprep.subr.mxu0 %v2814_v41 }
 0x141   :  { %3083 = vmatpush3.msra.mxu0 %v2814_v41 }
 0x142   :  { %3085 = vmatmul.mubr.msk.f32.vlgmr.msra.gmra.mxu0 %vm38_vm0, %v3496_v38  ;;  %3097 = vmatprep.subr.mxu0 %v3389_v42 }
 0x143   :  { %3099 = vmatprep.mubr.msk.f32.mxu0 %vm3390_vm1, %v3389_v42 }
 0x1fa   :  { %v3075_v44 = vpop.f32.mrf.mxu1  ;;  %v3064_v45 = vpop.f32.mrf.mxu0 }
 0x1fb   :  { %3098 = vmatpush3.xpose.msk.msra.mxu0 %vm324_vm2, %v3075_v44 }
 0x1fc   :  { %v235_v46 = vpop.f32.mrf.mxu1  ;;  %3107 = vmatprep.subr.mxu0 %v2829_v43  ;;  %v155_v48 = vpop.f32.mrf.mxu0 }
 0x1fd   :  { %3088 = vmatpush3.xpose.msk.msra.mxu1 %vm324_vm2, %v235_v46 }
 0x1fe   :  { %3100 = vmatmul.mubr.msk.f32.vlgmr.msra.gmra.mxu0 %vm324_vm2, %v3064_v45  ;;  %3092 = vmatprep.subr.mxu1 %v3389_v42 }
 0x1ff   :  { %3108 = vmatpush3.msra.mxu0 %v2829_v43  ;;  %3115 = vmatprep.mubr.msk.f32.mxu0 %vm38_vm0, %v3490_v36 }
 0x200   :  { %3090 = vmatmul.mubr.msk.f32.vlgmr.msra.gmra.mxu1 %vm324_vm2, %v155_v48  ;;  %3109 = vmatprep.subr.mxu0 %v2828_v47 }
 0x201   :  { %3110 = vmatpush3.msra.mxu0 %v2828_v47  ;;  %3094 = vmatprep.mubr.msk.f32.mxu1 %vm3390_vm1, %v3389_v42 }
 0x202   :  { %v3086_v51 = vpop.f32.mrf.mxu0  ;;  %3111 = vmatprep.subr.mxu0 %v2827_v49 }
 0x203   :  { %3112 = vmatpush3.msra.mxu0 %v2827_v49 }
 0x204   :  { %v315_v53 = vpop.f32.mrf.mxu0  ;;  %3113 = vmatprep.subr.mxu0 %v2826_v50 }
 0x205   :  { %3093 = vmatpush3.msra.mxu1 %v315_v53  ;;  %3114 = vmatpush3.msra.mxu0 %v2826_v50  ;;  %v647_v53 = vld [vmem:[%s3858_s4 + $0x8] sm:$0xff] }
 0x206   :  { %3116 = vmatmul.mubr.msk.f32.vlgmr.msra.gmra.mxu0 %vm38_vm0, %v3496_v38  ;;  %3129 = vmatprep.subr.mxu0 %v2841_v52 }
 0x207   :  { %3130 = vmatpush3.msra.mxu0 %v2841_v52  ;;  %3137 = vmatprep.mubr.msk.f32.mxu0 %vm38_vm0, %v3490_v36 }
 0x208   :  { %3131 = vmatprep.subr.mxu0 %v2840_v54  ;;  %3102 = vmatprep.subr.mxu1 %v3389_v42 }
 0x209   :  { %3132 = vmatpush3.msra.mxu0 %v2840_v54 }
 0x20a   :  { %3133 = vmatprep.subr.mxu0 %v2839_v55 }
 0x20b   :  { %3134 = vmatpush3.msra.mxu0 %v2839_v55  ;;  %v646_v55 = vld [vmem:[%s3858_s4] sm:$0xff] }
 0x20c   :  { %3135 = vmatprep.subr.mxu0 %v2838_v56 }
 0x20d   :  { %3136 = vmatpush3.msra.mxu0 %v2838_v56  ;;  %v2851_v56 = vld [vmem:[%s3858_s4 + $0x18] sm:$0xff] }
 0x20e   :  { %3138 = vmatmul.mubr.msk.f32.vlgmr.msra.gmra.mxu0 %vm38_vm0, %v3496_v38  ;;  %3150 = vmatprep.subr.mxu0 %v3389_v42 }
 0x20f   :  { %3152 = vmatprep.mubr.msk.f32.mxu0 %vm3390_vm1, %v3389_v42 }
 0x2be   :  { %v558_v57 = vpop.f32.mrf.mxu0 }
 0x2bf   :  { %v562_v58 = vsel %vm401_vm3, %v558_v57, -inf }
 0x2c0   :  { %v397_v59 = vpop.f32.mrf.mxu1  ;;  %563 = vmax.xlane.f32.xlu1 %v562_v58  ;;  %v3101_v60 = vpop.f32.mrf.mxu0 }
 0x2c1   :  { %v402_v61 = vsel %vm401_vm3, %v397_v59, -inf }
 0x2c2   :  { %403 = vmax.xlane.f32.xlu0 %v402_v61  ;;  %v3091_v62 = vpop.f32.mrf.mxu1 }
 0x2c6   :  { %v3117_v25 = vpop.f32.mrf.mxu0 }
 0x2c8   :  { %v719_v26 = vpop.f32.mrf.mxu0 }
 0x2ce   :  { %v3139_v28 = vpop.f32.mrf.mxu0 }
 0x2d0   :  { %v879_v30 = vpop.f32.mrf.mxu0 }
 0x349   :  { %v564_v63 = vpop.xlane.xlu1 %563 }
 0x34a   :  { %v565_v2 = vsub.f32 %v558_v57, %v564_v63  ;;  %v2850_v57 = vld [vmem:[%s3858_s4 + $0x10] sm:$0xff]  ;;  %v2856_v63 = vld [vmem:[%s3856_s2 + $0x4] ss:$0 sm:$0xff] }
 0x34b   :  { %v404_v3 = vpop.xlane.xlu0 %403 }
 0x34c   :  { %v566_v4 = vmul.f32 1.442695, %v565_v2  ;;  %v405_v5 = vsub.f32 %v397_v59, %v404_v3 }
 0x34e   :  { %3331 = vpow2.f32 %v566_v4  ;;  %v406_v6 = vmul.f32 1.442695, %v405_v5 }
 0x350   :  { %3333 = vpow2.f32 %v406_v6 }
 0x35b   :  { %v3332_v7 = vpop.eup %3331 }
 0x35c   :  { %v568_v8 = vsel %vm401_vm3, %v3332_v7, 0.0 }
 0x35d   :  { %v3334_v9 = vpop.eup %3333  ;;  %569 = vadd.xlane.f32.xlu1 %v568_v8 }
 0x35e   :  { %v408_v10 = vsel %vm401_vm3, %v3334_v9, 0.0 }
 0x35f   :  { %409 = vadd.xlane.f32.xlu0 %v408_v10 }
 0x3e6   :  { %v570_v11 = vpop.xlane.xlu1 %569 }
 0x3e8   :  { %v410_v12 = vpop.xlane.xlu0 %409 }
 0x3e9   :  { %3335 = vrcp.f32 %v410_v12 }
 0x3ea   :  { %3337 = vrcp.f32 %v570_v11 }
 0x3f6   :  { %v3336_v13 = vpop.eup %3335 }
 0x3f7   :  { %v412_v14 = vmul.f32 %v3336_v13, %v3334_v9  ;;  %v3338_v15 = vpop.eup %3337 }
 0x3f8   :  { %v572_v17 = vmul.f32 %v3338_v15, %v3332_v7 }
 0x3f9   :  { %3095 = vmatmul.mubr.msk.f32.vlgmr.msra.gmra.mxu1 %vm401_vm3, %v412_v14 }
 0x3fa   :  { %3103 = vmatpush3.msra.mxu1 %v3086_v51  ;;  %3104 = vmatprep.mubr.msk.f32.mxu1 %vm3390_vm1, %v3389_v42 }
 0x3fb   :  { %3118 = vmatprep.subr.mxu1 %v2835_v16 }
 0x3fd   :  { %3105 = vmatmul.mubr.msk.f32.vlgmr.msra.gmra.mxu1 %vm401_vm3, %v572_v17 }
 0x3fe   :  { %3119 = vmatpush3.msra.mxu1 %v2835_v16  ;;  %3126 = vmatprep.mubr.msk.f32.mxu1 %vm38_vm0, %v3490_v36 }
 0x3ff   :  { %3120 = vmatprep.subr.mxu1 %v2834_v18 }
 0x400   :  { %3121 = vmatpush3.msra.mxu1 %v2834_v18 }
 0x401   :  { %3122 = vmatprep.subr.mxu1 %v2833_v19 }
 0x402   :  { %3123 = vmatpush3.msra.mxu1 %v2833_v19 }
 0x403   :  { %3124 = vmatprep.subr.mxu1 %v2832_v20 }
 0x404   :  { %3125 = vmatpush3.msra.mxu1 %v2832_v20 }
 0x405   :  { %3127 = vmatmul.mubr.msk.f32.vlgmr.msra.gmra.mxu1 %vm38_vm0, %v3496_v38  ;;  %3140 = vmatprep.subr.mxu1 %v3389_v42 }
 0x406   :  { %3142 = vmatprep.mubr.msk.f32.mxu1 %vm3390_vm1, %v3389_v42 }
 0x4b9   :  { %v482_v21 = vpop.f32.mrf.mxu1 }
 0x4bb   :  { %v3096_v22 = vpop.f32.mrf.mxu1 }
 0x4bc   :  { %v1509_v22 = vld [vmem:[%s3860_s6 + $0x10] sm:$0xff] }
 0x4bd   :  { %v642_v23 = vpop.f32.mrf.mxu1 }
 0x4bf   :  { %v3106_v24 = vpop.f32.mrf.mxu1 }
 0x4c0   :  { %v1508_v24 = vld [vmem:[%s3860_s6 + $0x8] sm:$0xff] }
 0x4c5   :  { %v3128_v27 = vpop.f32.mrf.mxu1 }
 0x4c6   :  { %3151 = vmatpush3.xpose.msk.msra.mxu0 %vm324_vm2, %v3128_v27  ;;  %v1507_v27 = vld [vmem:[%s3860_s6] sm:$0xff] }
 0x4c7   :  { %v799_v29 = vpop.f32.mrf.mxu1  ;;  %3160 = vmatprep.subr.mxu0 %v2851_v56 }
 0x4c8   :  { %3141 = vmatpush3.xpose.msk.msra.mxu1 %vm324_vm2, %v799_v29  ;;  %v3663_v29 = vld [vmem:[%s3854_s0 + $0x8] sm:$0xff] }
 0x4c9   :  { %3153 = vmatmul.mubr.msk.f32.vlgmr.msra.gmra.mxu0 %vm324_vm2, %v3117_v25  ;;  %3145 = vmatprep.subr.mxu1 %v3389_v42  ;;  %v1425_v25 = vld [vmem:[%s3859_s5 + $0x18] sm:$0xff] }
 0x4ca   :  { %3161 = vmatpush3.msra.mxu0 %v2851_v56 }
 0x4cb   :  { %3143 = vmatmul.mubr.msk.f32.vlgmr.msra.gmra.mxu1 %vm324_vm2, %v719_v26  ;;  %3162 = vmatprep.subr.mxu0 %v2850_v57  ;;  %v1424_v26 = vld [vmem:[%s3859_s5 + $0x10] sm:$0xff] }
 0x4cc   :  { %3146 = vmatpush3.msra.mxu1 %v879_v30  ;;  %3147 = vmatprep.mubr.msk.f32.mxu1 %vm3390_vm1, %v3389_v42  ;;  %v1422_v30 = vld [vmem:[%s3859_s5] sm:$0xff] }
 0x4cd   :  { %3155 = vmatprep.subr.mxu1 %v3389_v42  ;;  %3163 = vmatpush3.msra.mxu0 %v2850_v57 }
 0x4ce   :  { %3174 = vmatprep.subr.mxu0 %v1425_v25 }
 0x589   :  { %v1120_v31 = vpop.f32.mrf.mxu0 }
 0x58a   :  { %v1124_v32 = vsel %vm401_vm3, %v1120_v31, -inf }
 0x58b   :  { %1125 = vmax.xlane.f32.xlu1 %v1124_v32  ;;  %v960_v33 = vpop.f32.mrf.mxu1  ;;  %v3154_v34 = vpop.f32.mrf.mxu0  ;;  %v3680_v32 = vld [vmem:[%s3854_s0 + $0x18] sm:$0xff] }
 0x58c   :  { %v964_v35 = vsel %vm401_vm3, %v960_v33, -inf }
 0x58d   :  { %965 = vmax.xlane.f32.xlu0 %v964_v35  ;;  %v3144_v36 = vpop.f32.mrf.mxu1 }
 0x614   :  { %v1126_v37 = vpop.xlane.xlu1 %1125 }
 0x615   :  { %v1127_v38 = vsub.f32 %v1120_v31, %v1126_v37  ;;  %v3671_v31 = vld [vmem:[%s3854_s0 + $0x10] sm:$0xff] }
 0x616   :  { %v966_v39 = vpop.xlane.xlu0 %965 }
 0x617   :  { %v1128_v40 = vmul.f32 1.442695, %v1127_v38  ;;  %v967_v41 = vsub.f32 %v960_v33, %v966_v39  ;;  %v2868_v33 = vld [vmem:[%s3860_s6 + $0x58] sm:$0xff] }
 0x619   :  { %3339 = vpow2.f32 %v1128_v40  ;;  %v968_v43 = vmul.f32 1.442695, %v967_v41  ;;  %v2857_v41 = vld [vmem:[%s3856_s2 + $0x2] ss:$0 sm:$0xff] }
 0x61b   :  { %3341 = vpow2.f32 %v968_v43 }
 0x626   :  { %v3340_v44 = vpop.eup %3339 }
 0x627   :  { %v1130_v45 = vsel %vm401_vm3, %v3340_v44, 0.0 }
 0x628   :  { %v3342_v46 = vpop.eup %3341  ;;  %1131 = vadd.xlane.f32.xlu1 %v1130_v45  ;;  %v2858_v45 = vld [vmem:[%s3856_s2 + $0x3] ss:$0 sm:$0xff] }
 0x629   :  { %v970_v47 = vsel %vm401_vm3, %v3342_v46, 0.0 }
 0x62a   :  { %971 = vadd.xlane.f32.xlu0 %v970_v47 }
 0x6b1   :  { %v1132_v48 = vpop.xlane.xlu1 %1131 }
 0x6b3   :  { %v972_v49 = vpop.xlane.xlu0 %971 }
 0x6b4   :  { %3343 = vrcp.f32 %v972_v49 }
 0x6b5   :  { %3345 = vrcp.f32 %v1132_v48 }
 0x6c1   :  { %v3344_v50 = vpop.eup %3343 }
 0x6c2   :  { %v974_v51 = vmul.f32 %v3344_v50, %v3342_v46  ;;  %v3346_v52 = vpop.eup %3345 }
 0x6c3   :  { %v1134_v54 = vmul.f32 %v3346_v52, %v3340_v44  ;;  %v2866_v52 = vld [vmem:[%s3860_s6 + $0x48] sm:$0xff] }
 0x6c4   :  { %3148 = vmatmul.mubr.msk.f32.vlgmr.msra.gmra.mxu1 %vm401_vm3, %v974_v51  ;;  %v2867_v51 = vld [vmem:[%s3860_s6 + $0x50] sm:$0xff] }
 0x6c5   :  { %3156 = vmatpush3.msra.mxu1 %v3139_v28  ;;  %3157 = vmatprep.mubr.msk.f32.mxu1 %vm3390_vm1, %v3389_v42  ;;  %v1423_v28 = vld [vmem:[%s3859_s5 + $0x8] sm:$0xff] }
 0x6c6   :  { %3167 = vmatprep.subr.mxu1 %v647_v53 }
 0x6c8   :  { %3158 = vmatmul.mubr.msk.f32.vlgmr.msra.gmra.mxu1 %vm401_vm3, %v1134_v54 }
 0x6c9   :  { %3168 = vmatpush3.msra.mxu1 %v647_v53  ;;  %3171 = vmatprep.mubr.msk.f32.mxu1 %vm324_vm2, %v482_v21  ;;  %v2865_v53 = vld [vmem:[%s3860_s6 + $0x40] sm:$0xff] }
 0x6ca   :  { %3169 = vmatprep.subr.mxu1 %v646_v55 }
 0x6cb   :  { %3170 = vmatpush3.msra.mxu1 %v646_v55 }
 0x6cc   :  { %3172 = vmatmul.mubr.msk.f32.vlgmr.msra.gmra.mxu1 %vm324_vm2, %v642_v23  ;;  %v3641_v23 = vld [vmem:[%s3854_s0] sm:$0xff] }
 0x6cd   :  { %3193 = vmatprep.mubr.msk.f32.mxu1 %vm38_vm0, %v3641_v23 }
 0x784   :  { %v1044_v58 = vpop.f32.mrf.mxu1 }
 0x785   :  { %3164 = vmatprep.mubr.msk.f32.mxu0 %vm324_vm2, %v1044_v58  ;;  %v2884_v58 = vld [vmem:[%s3859_s5 + $0x38] sm:$0xff] }
 0x786   :  { %v3149_v59 = vpop.f32.mrf.mxu1 }
 0x788   :  { %v1204_v60 = vpop.f32.mrf.mxu1 }
 0x789   :  { %3165 = vmatmul.mubr.msk.f32.vlgmr.msra.gmra.mxu0 %vm324_vm2, %v1204_v60  ;;  %v2883_v60 = vld [vmem:[%s3859_s5 + $0x30] sm:$0xff] }
 0x78a   :  { %v3159_v61 = vpop.f32.mrf.mxu1  ;;  %3175 = vmatpush3.msra.mxu0 %v1425_v25 }
 0x78b   :  { %3176 = vmatprep.subr.mxu0 %v1424_v26 }
 0x78c   :  { %v3173_v62 = vpop.f32.mrf.mxu1  ;;  %3177 = vmatpush3.msra.mxu0 %v1424_v26  ;;  %v2890_v26 = vld [vmem:[%s3860_s6 + $0x38] sm:$0xff] }
 0x78d   :  { %3178 = vmatprep.subr.mxu0 %v1423_v28 }
 0x78e   :  { %v1364_v4 = vpop.f32.mrf.mxu1  ;;  %3179 = vmatpush3.msra.mxu0 %v1423_v28  ;;  %v2889_v28 = vld [vmem:[%s3860_s6 + $0x30] sm:$0xff] }
 0x78f   :  { %3180 = vmatprep.subr.mxu0 %v1422_v30 }
 0x790   :  { %3181 = vmatpush3.msra.mxu0 %v1422_v30  ;;  %v2888_v30 = vld [vmem:[%s3860_s6 + $0x28] sm:$0xff] }
 0x791   :  { %3199 = vmatprep.subr.mxu0 %v2868_v33 }
 0x849   :  { %v3166_v2 = vpop.f32.mrf.mxu0 }
 0x84a   :  { %v1370_v3 = vadd.f32 %v3173_v62, %v3166_v2  ;;  %v2882_v62 = vld [vmem:[%s3859_s5 + $0x28] sm:$0xff] }
 0x84b   :  { %v1283_v5 = vpop.f32.mrf.mxu0 }
 0x84c   :  { %v1378_v6 = vadd.f32 %v2856_v63, %v1370_v3  ;;  %v1365_v7 = vadd.f32 %v1364_v4, %v1283_v5 }
 0x84e   :  { %v1377_v8 = vadd.f32 %v2856_v63, %v1365_v7  ;;  %v1380_v9 = vadd.f32 %v1378_v6, %v3447_v1  ;;  %v2881_v63 = vld [vmem:[%s3859_s5 + $0x20] sm:$0xff] }
 0x850   :  { %v1386_v10 = vsel %vm38_vm0, %v1380_v9, 0.0  ;;  %v1379_v11 = vadd.f32 %v1377_v8, %v3442_v0  ;;  %v1510_v0 = vld [vmem:[%s3860_s6 + $0x18] sm:$0xff] }
 0x851   :  { %1387 = vadd.xlane.f32.xlu1 %v1386_v10  ;;  %3185 = vmatprep.subr.mxu1 %v1510_v0 }
 0x852   :  { %v1383_v12 = vsel %vm38_vm0, %v1379_v11, 0.0  ;;  %3186 = vmatpush3.msra.mxu1 %v1510_v0 }
 0x853   :  { %1384 = vadd.xlane.f32.xlu0 %v1383_v12  ;;  %3187 = vmatprep.subr.mxu1 %v1509_v22 }
 0x854   :  { %3188 = vmatpush3.msra.mxu1 %v1509_v22 }
 0x855   :  { %3189 = vmatprep.subr.mxu1 %v1508_v24 }
 0x856   :  { %3190 = vmatpush3.msra.mxu1 %v1508_v24 }
 0x857   :  { %3191 = vmatprep.subr.mxu1 %v1507_v27 }
 0x858   :  { %3192 = vmatpush3.msra.mxu1 %v1507_v27 }
 0x859   :  { %3194 = vmatmul.mubr.msk.f32.vlgmr.msra.gmra.mxu1 %vm38_vm0, %v3663_v29  ;;  %3213 = vmatprep.subr.mxu1 %v3389_v42 }
 0x85a   :  { %3196 = vmatprep.mubr.msk.f32.mxu1 %vm38_vm0, %v3671_v31 }
 0x85d   :  { %3197 = vmatmul.mubr.msk.f32.gmra.mxu1 %vm38_vm0, %v3680_v32 }
 0x85e   :  { %3217 = vmatprep.mubr.msk.f32.mxu1 %vm3390_vm1, %v3389_v42 }
 0x8da   :  { %v1388_v13 = vpop.xlane.xlu1 %1387 }
 0x8db   :  { %v1390_v14 = vmul.f32 0.03125, %v1388_v13 }
 0x8dc   :  { %v1385_v15 = vpop.xlane.xlu0 %1384 }
 0x8dd   :  { %v1392_v16 = vsub.f32 %v1380_v9, %v1390_v14  ;;  %v1389_v17 = vmul.f32 0.03125, %v1385_v15 }
 0x8df   :  { %v1391_v18 = vsub.f32 %v1379_v11, %v1389_v17  ;;  %v1394_v19 = vmul.f32 %v1392_v16, %v1392_v16 }
 0x8e1   :  { %v1398_v20 = vsel %vm38_vm0, %v1394_v19, 0.0  ;;  %v1393_v21 = vmul.f32 %v1391_v18, %v1391_v18 }
 0x8e2   :  { %1399 = vadd.xlane.f32.xlu1 %v1398_v20 }
 0x8e3   :  { %v1395_v1 = vsel %vm38_vm0, %v1393_v21, 0.0 }
 0x8e4   :  { %1396 = vadd.xlane.f32.xlu0 %v1395_v1 }
 0x919   :  { %v3195_v54 = vpop.f32.mrf.mxu1 }
 0x91a   :  { %3214 = vmatpush3.xpose.msk.msra.mxu1 %vm324_vm2, %v3195_v54 }
 0x91b   :  { %v1589_v55 = vpop.f32.mrf.mxu1  ;;  %3215 = vmatprep.subr.mxu1 %v3389_v42 }
 0x91d   :  { %v3198_v56 = vpop.f32.mrf.mxu1 }
 0x91e   :  { %3216 = vmatpush3.xpose.msk.msra.mxu1 %vm324_vm2, %v1589_v55 }
 0x91f   :  { %v1599_v57 = vpop.f32.mrf.mxu1  ;;  %3220 = vmatprep.subr.mxu1 %v3389_v42 }
 0x96b   :  { %v1400_v34 = vpop.xlane.xlu1 %1399 }
 0x96c   :  { %v1402_v35 = vmul.f32 0.03125, %v1400_v34  ;;  %v2897_v34 = vld [vmem:[%s3860_s6 + $0x70] sm:$0xff] }
 0x96d   :  { %v1397_v36 = vpop.xlane.xlu0 %1396 }
 0x96e   :  { %v1404_v37 = vadd.f32 1e-05, %v1402_v35  ;;  %v1401_v38 = vmul.f32 0.03125, %v1397_v36  ;;  %v2896_v35 = vld [vmem:[%s3860_s6 + $0x68] sm:$0xff]  ;;  %v2895_v36 = vld [vmem:[%s3860_s6 + $0x60] sm:$0xff] }
 0x970   :  { %3347 = vrsqrt.f32 %v1404_v37  ;;  %v1403_v39 = vadd.f32 1e-05, %v1401_v38 }
 0x972   :  { %3349 = vrsqrt.f32 %v1403_v39 }
 0x97d   :  { %v3348_v40 = vpop.eup %3347 }
 0x97e   :  { %v1408_v43 = vmul.f32 %v3348_v40, %v1392_v16 }
 0x97f   :  { %v3350_v44 = vpop.eup %3349 }
 0x980   :  { %v1407_v46 = vmul.f32 %v3350_v44, %v1391_v18  ;;  %v1414_v47 = vmul.f32 %v2857_v41, %v1408_v43 }
 0x982   :  { %v1413_v48 = vmul.f32 %v2857_v41, %v1407_v46  ;;  %v1420_v49 = vadd.f32 %v2858_v45, %v1414_v47 }
 0x984   :  { %v1419_v50 = vadd.f32 %v2858_v45, %v1413_v48  ;;  %2787 = vst.msk [vmem:[#allocation2 + $0x18] sm:$0xff] %vm38_vm0, %v1420_v49 }
 0x986   :  { %3182 = vmatprep.mubr.msk.f32.mxu0 %vm38_vm0, %v1419_v50  ;;  %2786 = vst.msk [vmem:[#allocation2 + $0x10] sm:$0xff] %vm38_vm0, %v1419_v50 }
 0x987   :  { %3183 = vmatmul.mubr.msk.f32.vlgmr.msra.gmra.mxu0 %vm38_vm0, %v1420_v49 }
 0x988   :  { %3200 = vmatpush3.msra.mxu0 %v2868_v33  ;;  %3207 = vmatprep.mubr.msk.f32.mxu0 %vm38_vm0, %v3641_v23  ;;  %v2887_v33 = vld [vmem:[%s3860_s6 + $0x20] sm:$0xff] }
 0x989   :  { %3201 = vmatprep.subr.mxu0 %v2867_v51 }
 0x98a   :  { %3202 = vmatpush3.msra.mxu0 %v2867_v51 }
 0x98b   :  { %3203 = vmatprep.subr.mxu0 %v2866_v52 }
 0x98c   :  { %3204 = vmatpush3.msra.mxu0 %v2866_v52 }
 0x98d   :  { %3205 = vmatprep.subr.mxu0 %v2865_v53 }
 0x98e   :  { %3206 = vmatpush3.msra.mxu0 %v2865_v53 }
 0x98f   :  { %3227 = vmatprep.subr.mxu0 %v3389_v42  ;;  %3208 = vmatmul.mubr.msk.f32.vlgmr.msra.gmra.mxu0 %vm38_vm0, %v3663_v29 }
 0x990   :  { %3210 = vmatprep.mubr.msk.f32.mxu0 %vm38_vm0, %v3671_v31  ;;  %3228 = vmatpush3.xpose.msk.msra.mxu0 %vm324_vm2, %v3198_v56 }
 0x991   :  { %3229 = vmatprep.subr.mxu0 %v3389_v42 }
 0x993   :  { %3211 = vmatmul.mubr.msk.f32.gmra.mxu0 %vm38_vm0, %v3680_v32 }
 0x994   :  { %3231 = vmatprep.mubr.msk.f32.mxu0 %vm3390_vm1, %v3389_v42  ;;  %3230 = vmatpush3.xpose.msk.msra.mxu0 %vm324_vm2, %v1599_v57 }
 0x995   :  { %3241 = vmatprep.subr.mxu0 %v2884_v58 }
 0xa47   :  { %v3184_v59 = vpop.f32.mrf.mxu0 }
 0xa48   :  { %3232 = vmatmul.mubr.msk.f32.vlgmr.msra.gmra.mxu0 %vm324_vm2, %v3184_v59 }
 0xa49   :  { %3242 = vmatpush3.msra.mxu0 %v2884_v58  ;;  %v1498_v61 = vpop.f32.mrf.mxu0  ;;  %3249 = vmatprep.mubr.msk.f32.mxu0 %vm38_vm0, %v1419_v50 }
 0xa4a   :  { %3243 = vmatprep.subr.mxu0 %v2883_v60  ;;  %3218 = vmatmul.mubr.msk.f32.vlgmr.msra.gmra.mxu1 %vm324_vm2, %v1498_v61 }
 0xa4b   :  { %3244 = vmatpush3.msra.mxu0 %v2883_v60  ;;  %3224 = vmatprep.mubr.msk.f32.mxu1 %vm3390_vm1, %v3389_v42 }
 0xa4c   :  { %3245 = vmatprep.subr.mxu0 %v2882_v62 }
 0xa4d   :  { %3246 = vmatpush3.msra.mxu0 %v2882_v62 }
 0xa4e   :  { %3247 = vmatprep.subr.mxu0 %v2881_v63 }
 0xa4f   :  { %3248 = vmatpush3.msra.mxu0 %v2881_v63  ;;  %v3209_v2 = vpop.f32.mrf.mxu0 }
 0xa50   :  { %3250 = vmatmul.mubr.msk.f32.vlgmr.msra.gmra.mxu0 %vm38_vm0, %v1420_v49  ;;  %3221 = vmatpush3.msra.mxu1 %v3209_v2 }
 0xa51   :  { %v1679_v3 = vpop.f32.mrf.mxu0  ;;  %3222 = vmatprep.subr.mxu1 %v3389_v42  ;;  %3274 = vmatprep.mubr.msk.f32.mxu0 %vm38_vm0, %v3641_v23 }
 0xa52   :  { %3223 = vmatpush3.msra.mxu1 %v1679_v3 }
 0xa53   :  { %3234 = vmatprep.subr.mxu1 %v3389_v42  ;;  %v3212_v4 = vpop.f32.mrf.mxu0 }
 0xa55   :  { %v1689_v5 = vpop.f32.mrf.mxu0 }
 0xb08   :  { %v1936_v6 = vpop.f32.mrf.mxu0 }
 0xb09   :  { %v1940_v7 = vsel %vm324_vm2, %v1936_v6, -inf }
 0xb0a   :  { %1941 = vmax.xlane.f32.xlu1 %v1940_v7  ;;  %v1773_v8 = vpop.f32.mrf.mxu1  ;;  %v3233_v9 = vpop.f32.mrf.mxu0 }
 0xb0b   :  { %v1777_v10 = vsel %vm324_vm2, %v1773_v8, -inf }
 0xb0c   :  { %1778 = vmax.xlane.f32.xlu0 %v1777_v10  ;;  %v3219_v11 = vpop.f32.mrf.mxu1  ;;  %v2024_v10 = vld [vmem:[%s3861_s7] sm:$0xff] }
 0xb0d   :  { %v2911_v11 = vld [vmem:[%s3861_s7 + $0x10] sm:$0xff] }
 0xb10   :  { %v3251_v43 = vpop.f32.mrf.mxu0 }
 0xb93   :  { %v1942_v12 = vpop.xlane.xlu1 %1941 }
 0xb94   :  { %v1943_v13 = vsub.f32 %v1936_v6, %v1942_v12 }
 0xb95   :  { %v1779_v14 = vpop.xlane.xlu0 %1778 }
 0xb96   :  { %v1944_v15 = vmul.f32 1.442695, %v1943_v13  ;;  %v1780_v16 = vsub.f32 %v1773_v8, %v1779_v14  ;;  %v2025_v8 = vld [vmem:[%s3861_s7 + $0x8] sm:$0xff] }
 0xb98   :  { %3351 = vpow2.f32 %v1944_v15  ;;  %v1781_v17 = vmul.f32 1.442695, %v1780_v16 }
 0xb9a   :  { %3353 = vpow2.f32 %v1781_v17  ;;  %v2917_v17 = vld [vmem:[%s3856_s2 + $0x5] ss:$0 sm:$0xff] }
 0xba5   :  { %v3352_v18 = vpop.eup %3351 }
 0xba6   :  { %v1946_v19 = vsel %vm324_vm2, %v3352_v18, 0.0 }
 0xba7   :  { %v3354_v20 = vpop.eup %3353  ;;  %1947 = vadd.xlane.f32.xlu1 %v1946_v19 }
 0xba8   :  { %v1783_v21 = vsel %vm324_vm2, %v3354_v20, 0.0 }
 0xba9   :  { %1784 = vadd.xlane.f32.xlu0 %v1783_v21 }
 0xc30   :  { %v1948_v1 = vpop.xlane.xlu1 %1947 }
 0xc32   :  { %v1785_v0 = vpop.xlane.xlu0 %1784 }
 0xc33   :  { %3355 = vrcp.f32 %v1785_v0 }
 0xc34   :  { %3357 = vrcp.f32 %v1948_v1 }
 0xc40   :  { %v3356_v22 = vpop.eup %3355 }
 0xc41   :  { %v1787_v24 = vmul.f32 %v3356_v22, %v3354_v20  ;;  %v3358_v25 = vpop.eup %3357 }
 0xc42   :  { %v1950_v27 = vmul.f32 %v3358_v25, %v3352_v18 }
 0xc43   :  { %3225 = vmatmul.mubr.msk.f32.vlgmr.msra.gmra.mxu1 %vm324_vm2, %v1787_v24 }
 0xc44   :  { %3235 = vmatpush3.msra.mxu1 %v3212_v4  ;;  %3238 = vmatprep.mubr.msk.f32.mxu1 %vm3390_vm1, %v3389_v42 }
 0xc45   :  { %3236 = vmatprep.subr.mxu1 %v3389_v42 }
 0xc46   :  { %3237 = vmatpush3.msra.mxu1 %v1689_v5 }
 0xc47   :  { %3252 = vmatprep.subr.mxu1 %v2890_v26  ;;  %3239 = vmatmul.mubr.msk.f32.vlgmr.msra.gmra.mxu1 %vm324_vm2, %v1950_v27 }
 0xc48   :  { %3253 = vmatpush3.msra.mxu1 %v2890_v26  ;;  %3260 = vmatprep.mubr.msk.f32.mxu1 %vm38_vm0, %v3641_v23  ;;  %v2898_v23 = vld [vmem:[%s3860_s6 + $0x78] sm:$0xff] }
 0xc49   :  { %3254 = vmatprep.subr.mxu1 %v2889_v28  ;;  %3266 = vmatprep.subr.mxu0 %v2898_v23 }
 0xc4a   :  { %3255 = vmatpush3.msra.mxu1 %v2889_v28  ;;  %3267 = vmatpush3.msra.mxu0 %v2898_v23 }
 0xc4b   :  { %3256 = vmatprep.subr.mxu1 %v2888_v30  ;;  %3268 = vmatprep.subr.mxu0 %v2897_v34 }
 0xc4c   :  { %3257 = vmatpush3.msra.mxu1 %v2888_v30  ;;  %3269 = vmatpush3.msra.mxu0 %v2897_v34 }
 0xc4d   :  { %3258 = vmatprep.subr.mxu1 %v2887_v33  ;;  %3270 = vmatprep.subr.mxu0 %v2896_v35 }
 0xc4e   :  { %3259 = vmatpush3.msra.mxu1 %v2887_v33  ;;  %3271 = vmatpush3.msra.mxu0 %v2896_v35 }
 0xc4f   :  { %3261 = vmatmul.mubr.msk.f32.vlgmr.msra.gmra.mxu1 %vm38_vm0, %v3663_v29  ;;  %3280 = vmatprep.subr.mxu1 %v3389_v42 }
 0xc50   :  { %3263 = vmatprep.mubr.msk.f32.mxu1 %vm38_vm0, %v3671_v31  ;;  %3272 = vmatprep.subr.mxu0 %v2895_v36 }
 0xc51   :  { %3273 = vmatpush3.msra.mxu0 %v2895_v36 }
 0xc52   :  { %3275 = vmatmul.mubr.msk.f32.vlgmr.msra.gmra.mxu0 %vm38_vm0, %v3663_v29  ;;  %3294 = vmatprep.subr.mxu0 %v3389_v42 }
 0xc53   :  { %3264 = vmatmul.mubr.msk.f32.gmra.mxu1 %vm38_vm0, %v3680_v32  ;;  %3277 = vmatprep.mubr.msk.f32.mxu0 %vm38_vm0, %v3671_v31 }
 0xc54   :  { %3284 = vmatprep.mubr.msk.f32.mxu1 %vm3390_vm1, %v3389_v42 }
 0xc56   :  { %3278 = vmatmul.mubr.msk.f32.gmra.mxu0 %vm38_vm0, %v3680_v32  ;;  %v2097_v32 = vpop.f32.mrf.mxu0 }
 0xc57   :  { %3298 = vmatprep.mubr.msk.f32.mxu0 %vm3390_vm1, %v3389_v42 }
 0xd03   :  { %v3802_v37 = vpop.f32.mrf.mxu1 }
 0xd05   :  { %v3226_v38 = vpop.f32.mrf.mxu1 }
 0xd07   :  { %v3804_v39 = vpop.f32.mrf.mxu1 }
 0xd09   :  { %v3240_v40 = vpop.f32.mrf.mxu1 }
 0xd0f   :  { %v3262_v41 = vpop.f32.mrf.mxu1 }
 0xd10   :  { %3281 = vmatpush3.xpose.msk.msra.mxu1 %vm324_vm2, %v3262_v41 }
 0xd11   :  { %v2177_v29 = vpop.f32.mrf.mxu1  ;;  %3282 = vmatprep.subr.mxu1 %v3389_v42 }
 0xd12   :  { %v3276_v45 = vpop.f32.mrf.mxu0 }
 0xd13   :  { %v3265_v31 = vpop.f32.mrf.mxu1 }
 0xd14   :  { %3283 = vmatpush3.xpose.msk.msra.mxu1 %vm324_vm2, %v2177_v29  ;;  %3295 = vmatpush3.xpose.msk.msra.mxu0 %vm324_vm2, %v3265_v31  ;;  %v2267_v46 = vpop.f32.mrf.mxu0 }
 0xd15   :  { %3296 = vmatprep.subr.mxu0 %v3389_v42  ;;  %3287 = vmatprep.subr.mxu1 %v3389_v42  ;;  %v2187_v44 = vpop.f32.mrf.mxu1 }
 0xd16   :  { %v3279_v47 = vpop.f32.mrf.mxu0 }
 0xd17   :  { %3285 = vmatmul.mubr.msk.f32.vlgmr.msra.gmra.mxu1 %vm324_vm2, %v2097_v32 }
 0xd18   :  { %3297 = vmatpush3.xpose.msk.msra.mxu0 %vm324_vm2, %v2187_v44  ;;  %3291 = vmatprep.mubr.msk.f32.mxu1 %vm3390_vm1, %v3389_v42  ;;  %v2277_v50 = vpop.f32.mrf.mxu0 }
 0xd19   :  { %3288 = vmatpush3.msra.mxu1 %v3276_v45 }
 0xd1a   :  { %3289 = vmatprep.subr.mxu1 %v3389_v42 }
 0xd1b   :  { %3299 = vmatmul.mubr.msk.f32.vlgmr.msra.gmra.mxu0 %vm324_vm2, %v3251_v43  ;;  %3290 = vmatpush3.msra.mxu1 %v2267_v46 }
 0xd1c   :  { %3301 = vmatprep.subr.mxu1 %v3389_v42 }
 0xdd7   :  { %v2361_v48 = vpop.f32.mrf.mxu1 }
 0xdd8   :  { %v2365_v49 = vsel %vm324_vm2, %v2361_v48, -inf }
 0xdd9   :  { %2366 = vmax.xlane.f32.xlu0 %v2365_v49  ;;  %v3286_v51 = vpop.f32.mrf.mxu1 }
 0xddb   :  { %v2524_v52 = vpop.f32.mrf.mxu0 }
 0xddc   :  { %v2528_v53 = vsel %vm324_vm2, %v2524_v52, -inf }
 0xddd   :  { %2529 = vmax.xlane.f32.xlu1 %v2528_v53  ;;  %v3300_v54 = vpop.f32.mrf.mxu0 }
 0xe62   :  { %v2367_v55 = vpop.xlane.xlu0 %2366 }
 0xe63   :  { %v2368_v56 = vsub.f32 %v2361_v48, %v2367_v55 }
 0xe65   :  { %v2369_v57 = vmul.f32 1.442695, %v2368_v56 }
 0xe66   :  { %v2530_v58 = vpop.xlane.xlu1 %2529 }
 0xe67   :  { %3359 = vpow2.f32 %v2369_v57  ;;  %v2531_v59 = vsub.f32 %v2524_v52, %v2530_v58 }
 0xe69   :  { %v2532_v60 = vmul.f32 1.442695, %v2531_v59 }
 0xe6b   :  { %3361 = vpow2.f32 %v2532_v60 }
 0xe74   :  { %v3360_v61 = vpop.eup %3359 }
 0xe75   :  { %v2371_v62 = vsel %vm324_vm2, %v3360_v61, 0.0 }
 0xe76   :  { %2372 = vadd.xlane.f32.xlu0 %v2371_v62 }
 0xe78   :  { %v3362_v63 = vpop.eup %3361 }
 0xe79   :  { %v2534_v2 = vsel %vm324_vm2, %v3362_v63, 0.0 }
 0xe7a   :  { %2535 = vadd.xlane.f32.xlu1 %v2534_v2 }
 0xeff   :  { %v2373_v3 = vpop.xlane.xlu0 %2372 }
 0xf00   :  { %3363 = vrcp.f32 %v2373_v3 }
 0xf03   :  { %v2536_v4 = vpop.xlane.xlu1 %2535 }
 0xf04   :  { %3365 = vrcp.f32 %v2536_v4 }
 0xf0d   :  { %v3364_v5 = vpop.eup %3363 }
 0xf0e   :  { %v2375_v6 = vmul.f32 %v3364_v5, %v3360_v61 }
 0xf10   :  { %3292 = vmatmul.mubr.msk.f32.vlgmr.msra.gmra.mxu1 %vm324_vm2, %v2375_v6 }
 0xf11   :  { %v3366_v7 = vpop.eup %3365  ;;  %3302 = vmatpush3.msra.mxu1 %v3279_v47  ;;  %3305 = vmatprep.mubr.msk.f32.mxu1 %vm3390_vm1, %v3389_v42 }
 0xf12   :  { %3303 = vmatprep.subr.mxu1 %v3389_v42  ;;  %v2538_v9 = vmul.f32 %v3366_v7, %v3362_v63  ;;  %v2912_v42 = vld [vmem:[%s3861_s7 + $0x18] sm:$0xff]  ;;  %s3391_s7 = smov [#allocation2]  }
 0xf13   :  { %3304 = vmatpush3.msra.mxu1 %v2277_v50  ;;  %3308 = vmatprep.subr.mxu0 %v2912_v42  ;;  %s2793_s14 = sshll.u32 %s3391_s7, 4  ;;  %s2794_s14 = int_to_ptr.vmem [resolvable:$true] %s2793_s14 }
 0xf14   :  { %3306 = vmatmul.mubr.msk.f32.vlgmr.msra.gmra.mxu1 %vm324_vm2, %v2538_v9  ;;  %3315 = vmatprep.subr.mxu1 %v2025_v8  ;;  %s3367_s15 = scalar_lea.vmem %s2794_s14, 512  ;;  %p3372_p1 = scmp.lt.s32.totalorder %s2794_s14, %s2794_s14 }
 0xf15   :  { %3316 = vmatpush3.msra.mxu1 %v2025_v8  ;;  %3319 = vmatprep.mubr.msk.f32.mxu1 %vm324_vm2, %v3802_v37  ;;  %p3368_p0 = scmp.ne.s32.totalorder %s2794_s14, %s3367_s15  ;;  %p3373_p2 = scmp.lt.s32.totalorder %s3367_s15, %s3367_s15 }
 0xf16   :  { %3317 = vmatprep.subr.mxu1 %v2024_v10  ;;  %3309 = vmatpush3.msra.mxu0 %v2912_v42 }
 0xf17   :  { %3318 = vmatpush3.msra.mxu1 %v2024_v10  ;;  %3310 = vmatprep.subr.mxu0 %v2911_v11  ;;  %p3374_p3 = por %p3373_p2, %p3372_p1 }
 0xf18   :  { %3320 = vmatmul.mubr.msk.f32.vlgmr.msra.gmra.mxu1 %vm324_vm2, %v3804_v39  ;;  %3311 = vmatpush3.msra.mxu0 %v2911_v11 }
 0xf19   :  { %p3375_p4 = pnand %p3374_p3, %p3368_p0 }
 0xfd0   :  { %v2445_v12 = vpop.f32.mrf.mxu1 }
 0xfd1   :  { %3312 = vmatprep.mubr.msk.f32.mxu0 %vm324_vm2, %v2445_v12 }
 0xfd2   :  { %v3293_v13 = vpop.f32.mrf.mxu1 }
 0xfd4   :  { %v2608_v14 = vpop.f32.mrf.mxu1 }
 0xfd5   :  { %3313 = vmatmul.mubr.msk.f32.vlgmr.msra.gmra.mxu0 %vm324_vm2, %v2608_v14 }
 0xfd6   :  { %v3307_v15 = vpop.f32.mrf.mxu1 }
 0xfd8   :  { %v3321_v16 = vpop.f32.mrf.mxu1 }
 0xfda   :  { %v2768_v20 = vpop.f32.mrf.mxu1 }
0x1095   :  { %v3314_v18 = vpop.f32.mrf.mxu0 }
0x1096   :  { %v2774_v19 = vadd.f32 %v3321_v16, %v3314_v18 }
0x1097   :  { %v2687_v21 = vpop.f32.mrf.mxu0 }
0x1098   :  { %v2782_v1 = vadd.f32 %v2917_v17, %v2774_v19  ;;  %v2769_v0 = vadd.f32 %v2768_v20, %v2687_v21 }
0x109a   :  { %2784 = vst.msk [vmem:[#allocation2 + $0x8] sm:$0xff] %vm38_vm0, %v2782_v1  ;;  %v2781_v22 = vadd.f32 %v2917_v17, %v2769_v0 }
0x109c   :  { %2783 = vst.msk [vmem:[#allocation2] sm:$0xff] %vm38_vm0, %v2781_v22 }
0x109d   :  { %3378 = shalt.err (!%p3375_p4)
}
0x109e   :  { %s3392_s2 = smov 128   ;;  %s3393_s5 = smov 8  }
0x109f   :  { %2799 = dma.vmem_to_hbm [thread:$0]  %s2794_s14, 512, %s3862_s8, [#allocation3], %s3392_s2, %s3392_s2, %s3393_s5  }
0x10a0   :  { %3387 = dma.done.wait [#allocation3], 512  }
0x10a1   :  { %3388 = vsyncadd [#allocation3], 4294966784 }
0x10a2   :  { %2803 = vsyncpa [#allocation3], 1 }

</bundles_post_ra>
